<compile_context>
chip_gen: v5e
topology: v5e:2x2
jax: 0.10.0
libtpu: 0.0.40
codegen_flags: <defaults>
</compile_context>

<pallas_src>
import functools
import math

import jax
import jax.numpy as jnp
from jax.experimental import pallas as pl
from jax.experimental.pallas import tpu as pltpu


# ----------------------------------------------------------------------------
# Shared math helper (used inside the kernel and by the pure-JAX reference)
# ----------------------------------------------------------------------------
def _layer_norm(x, gamma, beta, eps=1e-6):
    """LayerNorm exactly as the PyTorch module: unbiased std, / (std + eps)."""
    mean = jnp.mean(x, axis=-1, keepdims=True)
    diff = x - mean
    var = jnp.sum(diff * diff, axis=-1, keepdims=True) / (x.shape[-1] - 1)
    return gamma * diff / (jnp.sqrt(var) + eps) + beta


# ----------------------------------------------------------------------------
# Fully-fused encoder kernel: all layers + final LN, one grid step per batch
# ----------------------------------------------------------------------------
def _encoder_kernel(x_ref, mask_ref,
                    ln1a_ref, ln1b_ref, wqkv_ref, bqkv_ref, wo_ref, bo_ref,
                    ln2a_ref, ln2b_ref, w1_ref, b1_ref, w2_ref, b2_ref,
                    flna_ref, flnb_ref, o_ref, *, num_layers, num_heads, d_k):
    bf16, f32 = jnp.bfloat16, jnp.float32
    x = x_ref[0]                       # (S, D) f32
    madd = mask_ref[0]                 # (S, S) f32 additive mask (0 or -1e9)
    S, D = x.shape

    for l in range(num_layers):        # static unroll: whole stack in VMEM
        # -------- sublayer 0: x + SelfAttention(LayerNorm(x), mask) ---------
        xn = _layer_norm(x, ln1a_ref[l], ln1b_ref[l])
        xh = jnp.broadcast_to(xn.astype(bf16)[None], (num_heads, S, D))
        # Head-batched fused QKV projection (1/sqrt(d_k) folded into Q cols).
        qkv = jnp.einsum('hsd,hdf->hsf', xh, wqkv_ref[l],
                         preferred_element_type=f32) + bqkv_ref[l]   # (H,S,3dk)
        qkv = qkv.astype(bf16)                                       # cast once
        q = qkv[..., :d_k]
        k = qkv[..., d_k:2 * d_k]
        v = qkv[..., 2 * d_k:]
        s = jnp.einsum('hqd,hkd->hqk', q, k,
                       preferred_element_type=f32)                   # (H,S,S)
        s = s + madd[None]                    # one additive mask add (all heads)
        s = s - jnp.max(s, axis=-1, keepdims=True)
        p = jnp.exp(s)
        p = p * pl.reciprocal(jnp.sum(p, axis=-1, keepdims=True), approx=True)
        ctx = jnp.einsum('hqk,hkd->hqd', p.astype(bf16), v,
                         preferred_element_type=f32)                 # (H,S,dk)
        # Output projection per head against (H, d_k, D) then sum over heads:
        # no jnp.concatenate / lane re-assembly needed.
        attn = jnp.einsum('hsd,hdf->hsf', ctx.astype(bf16), wo_ref[l],
                          preferred_element_type=f32)                # (H,S,D)
        x = x + jnp.sum(attn, axis=0) + bo_ref[l]   # dropout == identity

        # -------- sublayer 1: x + FFN(LayerNorm(x)) --------------------------
        xn = _layer_norm(x, ln2a_ref[l], ln2b_ref[l])
        h1 = jnp.dot(xn.astype(bf16), w1_ref[l],
                     preferred_element_type=f32) + b1_ref[l]   # (S, 128) dense
        h1 = jnp.maximum(h1, 0.0)
        ff = jnp.dot(h1.astype(bf16), w2_ref[l],
                     preferred_element_type=f32) + b2_ref[l]
        x = x + ff

    # Final encoder LayerNorm, fused into the same kernel.
    o_ref[0] = _layer_norm(x, flna_ref[...], flnb_ref[...]).astype(o_ref.dtype)


_PARAM_ORDER = ("ln1_a", "ln1_b", "wqkv", "bqkv", "wo", "bo",
                "ln2_a", "ln2_b", "w1", "b1", "w2", "b2")


def pallas_encoder(x, mask, params, final_ln, *, num_heads):
    """Whole Encoder forward (all layers + final LN) in a single pallas_call."""
    B, S, D = x.shape
    L = params["wqkv"].shape[0]
    d_k = D // num_heads

    # Precompute the additive mask once in the wrapper (0 visible, -1e9 masked).
    mask_add = jnp.where(mask == 0.0, -1e9, 0.0).astype(jnp.float32)

    kernel = functools.partial(_encoder_kernel, num_layers=L,
                               num_heads=num_heads, d_k=d_k)

    def whole(a):   # full-array weight block; constant index map -> fetched once
        return pl.BlockSpec(a.shape, lambda b, _nd=a.ndim: (0,) * _nd)

    bmap = lambda b: (b, 0, 0)
    in_specs = ([pl.BlockSpec((1, S, D), bmap),      # x
                 pl.BlockSpec((1, S, S), bmap)]      # additive mask (per batch)
                + [whole(params[k]) for k in _PARAM_ORDER]
                + [whole(final_ln["a"]), whole(final_ln["b"])])

    return pl.pallas_call(
        kernel,
        out_shape=jax.ShapeDtypeStruct((B, S, D), jnp.float32),
        grid=(B,),                                   # 2 parallel steps on v7x
        in_specs=in_specs,
        out_specs=pl.BlockSpec((1, S, D), bmap),     # lane-dense (S, 128) writes
        compiler_params=pltpu.CompilerParams(
            dimension_semantics=("parallel",)),
    )(x, mask_add, *[params[k] for k in _PARAM_ORDER],
      final_ln["a"], final_ln["b"])


# ----------------------------------------------------------------------------
# One-time weight preparation
# ----------------------------------------------------------------------------
def prepare_params(raw_layers, *, num_heads, d_ff_pad):
    """Fuse per-head QKV weights, fold 1/sqrt(d_k) into Q, pre-transpose all
    weights, zero-pad d_ff to a lane-dense width, stack layers on a leading
    axis.  Matmul operands in bf16, biases / LayerNorm params in f32."""
    f32, bf16 = jnp.float32, jnp.bfloat16
    per_layer = []
    for raw in raw_layers:
        D = raw["wq"].shape[0]
        d_k = D // num_heads
        scale = 1.0 / math.sqrt(d_k)
        # Per-head fused QKV weight (H, D, 3*d_k); 1/sqrt(d_k) folded into Q.
        wq_t = (raw["wq"].T * scale).reshape(D, num_heads, d_k)
        wk_t = raw["wk"].T.reshape(D, num_heads, d_k)
        wv_t = raw["wv"].T.reshape(D, num_heads, d_k)
        wqkv = jnp.concatenate([wq_t, wk_t, wv_t], axis=-1).transpose(1, 0, 2)
        bq = (raw["bq"] * scale).reshape(num_heads, 1, d_k)
        bk = raw["bk"].reshape(num_heads, 1, d_k)
        bv = raw["bv"].reshape(num_heads, 1, d_k)
        bqkv = jnp.concatenate([bq, bk, bv], axis=-1)          # (H, 1, 3*d_k)
        wo = raw["wo"].T.reshape(num_heads, d_k, D)            # (H, d_k, D)
        # FFN weights pre-transposed; d_ff zero-padded (ReLU(0)=0 => identical).
        d_ff = raw["w1"].shape[0]
        pad = d_ff_pad - d_ff
        w1 = jnp.pad(raw["w1"].T, ((0, 0), (0, pad)))          # (D, d_ff_pad)
        b1 = jnp.pad(raw["b1"], ((0, pad),)).reshape(1, -1)
        w2 = jnp.pad(raw["w2"].T, ((0, pad), (0, 0)))          # (d_ff_pad, D)
        per_layer.append({
            "ln1_a": raw["ln1_a"].reshape(1, -1).astype(f32),
            "ln1_b": raw["ln1_b"].reshape(1, -1).astype(f32),
            "wqkv": wqkv.astype(bf16),
            "bqkv": bqkv.astype(f32),
            "wo": wo.astype(bf16),
            "bo": raw["bo"].reshape(1, -1).astype(f32),
            "ln2_a": raw["ln2_a"].reshape(1, -1).astype(f32),
            "ln2_b": raw["ln2_b"].reshape(1, -1).astype(f32),
            "w1": w1.astype(bf16),
            "b1": b1.astype(f32),
            "w2": w2.astype(bf16),
            "b2": raw["b2"].reshape(1, -1).astype(f32),
        })
    return {k: jnp.stack([p[k] for p in per_layer]) for k in per_layer[0]}


# ----------------------------------------------------------------------------
# Pure-JAX reference (PyTorch Encoder forward, eval mode).  Uses the same
# prepared weights and the same bf16-operand / f32-accumulate policy so the
# comparison isolates kernel correctness.
# ----------------------------------------------------------------------------
def reference_encoder(x, mask, params, final_ln, num_heads):
    bf16, f32 = jnp.bfloat16, jnp.float32
    L = params["wqkv"].shape[0]
    d_k = params["wqkv"].shape[-1] // 3
    mask_add = jnp.where(mask == 0.0, -1e9, 0.0).astype(f32)
    for l in range(L):
        xn = _layer_norm(x, params["ln1_a"][l], params["ln1_b"][l])
        qkv = jnp.einsum("bsd,hdf->bhsf", xn.astype(bf16), params["wqkv"][l],
                         preferred_element_type=f32) + params["bqkv"][l][None]
        qkv = qkv.astype(bf16)
        q, k, v = qkv[..., :d_k], qkv[..., d_k:2 * d_k], qkv[..., 2 * d_k:]
        s = jnp.einsum("bhqd,bhkd->bhqk", q, k,
                       preferred_element_type=f32) + mask_add[:, None]
        p = jax.nn.softmax(s, axis=-1)
        ctx = jnp.einsum("bhqk,bhkd->bhqd", p.astype(bf16), v,
                         preferred_element_type=f32)
        attn = jnp.einsum("bhsd,hdf->bsf", ctx.astype(bf16), params["wo"][l],
                          preferred_element_type=f32)
        x = x + attn + params["bo"][l]
        xn = _layer_norm(x, params["ln2_a"][l], params["ln2_b"][l])
        h1 = jnp.maximum(
            jnp.einsum("bsd,df->bsf", xn.astype(bf16), params["w1"][l],
                       preferred_element_type=f32) + params["b1"][l], 0.0)
        x = x + jnp.einsum("bsf,fd->bsd", h1.astype(bf16), params["w2"][l],
                           preferred_element_type=f32) + params["b2"][l]
    return _layer_norm(x, final_ln["a"], final_ln["b"])


# ----------------------------------------------------------------------------
if __name__ == "__main__":
    # Small shapes consistent with the module structure:
    # d_model=128, heads=4 (d_k=32), d_ff=64 (as in the spec, padded to 128),
    # 2 stacked encoder layers, batch=2, seq=8.
    B, S, D, H, D_FF, D_FF_PAD, N_LAYERS = 2, 8, 128, 4, 64, 128, 2

    root = jax.random.PRNGKey(0)
    keys = jax.random.split(root, N_LAYERS + 1)

    def init_layer(key):
        ks = jax.random.split(key, 12)
        w = lambda k, o, i: 0.05 * jax.random.normal(k, (o, i), jnp.float32)
        b = lambda k, o: 0.05 * jax.random.normal(k, (o,), jnp.float32)
        return {
            "wq": w(ks[0], D, D), "bq": b(ks[1], D),
            "wk": w(ks[2], D, D), "bk": b(ks[3], D),
            "wv": w(ks[4], D, D), "bv": b(ks[5], D),
            "wo": w(ks[6], D, D), "bo": b(ks[7], D),
            "w1": w(ks[8], D_FF, D), "b1": b(ks[9], D_FF),
            "w2": w(ks[10], D, D_FF), "b2": b(ks[11], D),
            "ln1_a": jnp.ones((D,), jnp.float32), "ln1_b": jnp.zeros((D,), jnp.float32),
            "ln2_a": jnp.ones((D,), jnp.float32), "ln2_b": jnp.zeros((D,), jnp.float32),
        }

    raw_layers = [init_layer(keys[i]) for i in range(N_LAYERS)]
    params = prepare_params(raw_layers, num_heads=H, d_ff_pad=D_FF_PAD)
    final_ln = {"a": jnp.ones((1, D), jnp.float32),
                "b": jnp.zeros((1, D), jnp.float32)}

    x = jax.random.normal(keys[N_LAYERS], (B, S, D), dtype=jnp.float32)
    # Per-batch 0/1 mask (0 => masked_fill(-1e9) like the PyTorch code):
    # causal for both batch elements, plus the last 2 key positions padded out
    # for batch element 1, to exercise per-batch masking.
    causal = jnp.tril(jnp.ones((S, S), jnp.float32))
    key_keep = jnp.ones((S,), jnp.float32).at[-2:].set(0.0)
    mask = jnp.stack([causal, causal * key_keep[None, :]], axis=0)   # (B, S, S)

    fwd = jax.jit(functools.partial(pallas_encoder, num_heads=H))
    out = jax.block_until_ready(fwd(x, mask, params, final_ln))

    ref = reference_encoder(x, mask, params, final_ln, H)
    assert out.shape == (B, S, D)
    assert jnp.allclose(out, ref, atol=2e-2, rtol=2e-2), "mismatch vs reference"

    print("KERNEL_OK")
</pallas_src>

<mosaic_0001>
module attributes {stable_mosaic.version = 11 : i64} {
  func.func @_encoder_kernel(%arg0: i32, %arg1: memref<1x8x128xf32, #tpu.memory_space<vmem>>, %arg2: memref<1x8x8xf32, #tpu.memory_space<vmem>>, %arg3: memref<2x1x128xf32, #tpu.memory_space<vmem>>, %arg4: memref<2x1x128xf32, #tpu.memory_space<vmem>>, %arg5: memref<2x4x128x96xbf16, #tpu.memory_space<vmem>>, %arg6: memref<2x4x1x96xf32, #tpu.memory_space<vmem>>, %arg7: memref<2x4x32x128xbf16, #tpu.memory_space<vmem>>, %arg8: memref<2x1x128xf32, #tpu.memory_space<vmem>>, %arg9: memref<2x1x128xf32, #tpu.memory_space<vmem>>, %arg10: memref<2x1x128xf32, #tpu.memory_space<vmem>>, %arg11: memref<2x128x128xbf16, #tpu.memory_space<vmem>>, %arg12: memref<2x1x128xf32, #tpu.memory_space<vmem>>, %arg13: memref<2x128x128xbf16, #tpu.memory_space<vmem>>, %arg14: memref<2x1x128xf32, #tpu.memory_space<vmem>>, %arg15: memref<1x128xf32, #tpu.memory_space<vmem>>, %arg16: memref<1x128xf32, #tpu.memory_space<vmem>>, %arg17: memref<1x8x128xf32, #tpu.memory_space<vmem>>) attributes {dimension_semantics = [#tpu.dimension_semantics<parallel>], iteration_bounds = array<i64: 2>, scalar_prefetch = 0 : i64, scratch_operands = 0 : i64, tpu.core_type = #tpu.core_type<tc>, window_params = [{transform_indices = @transform_0, window_bounds = array<i64: 1, 8, 128>}, {transform_indices = @transform_1, window_bounds = array<i64: 1, 8, 8>}, {pipeline_mode = #tpu.pipeline_mode<synchronous>, transform_indices = @transform_2, window_bounds = array<i64: 2, 1, 128>}, {pipeline_mode = #tpu.pipeline_mode<synchronous>, transform_indices = @transform_3, window_bounds = array<i64: 2, 1, 128>}, {pipeline_mode = #tpu.pipeline_mode<synchronous>, transform_indices = @transform_4, window_bounds = array<i64: 2, 4, 128, 96>}, {pipeline_mode = #tpu.pipeline_mode<synchronous>, transform_indices = @transform_5, window_bounds = array<i64: 2, 4, 1, 96>}, {pipeline_mode = #tpu.pipeline_mode<synchronous>, transform_indices = @transform_6, window_bounds = array<i64: 2, 4, 32, 128>}, {pipeline_mode = #tpu.pipeline_mode<synchronous>, transform_indices = @transform_7, window_bounds = array<i64: 2, 1, 128>}, {pipeline_mode = #tpu.pipeline_mode<synchronous>, transform_indices = @transform_8, window_bounds = array<i64: 2, 1, 128>}, {pipeline_mode = #tpu.pipeline_mode<synchronous>, transform_indices = @transform_9, window_bounds = array<i64: 2, 1, 128>}, {pipeline_mode = #tpu.pipeline_mode<synchronous>, transform_indices = @transform_10, window_bounds = array<i64: 2, 128, 128>}, {pipeline_mode = #tpu.pipeline_mode<synchronous>, transform_indices = @transform_11, window_bounds = array<i64: 2, 1, 128>}, {pipeline_mode = #tpu.pipeline_mode<synchronous>, transform_indices = @transform_12, window_bounds = array<i64: 2, 128, 128>}, {pipeline_mode = #tpu.pipeline_mode<synchronous>, transform_indices = @transform_13, window_bounds = array<i64: 2, 1, 128>}, {pipeline_mode = #tpu.pipeline_mode<synchronous>, transform_indices = @transform_14, window_bounds = array<i64: 1, 128>}, {pipeline_mode = #tpu.pipeline_mode<synchronous>, transform_indices = @transform_15, window_bounds = array<i64: 1, 128>}, {transform_indices = @transform_16, window_bounds = array<i64: 1, 8, 128>}]} {
    %c0 = arith.constant 0 : index
    %c0_0 = arith.constant 0 : index
    %c0_1 = arith.constant 0 : index
    %0 = vector.load %arg1[%c0, %c0_0, %c0_1] : memref<1x8x128xf32, #tpu.memory_space<vmem>>, vector<1x8x128xf32>
    %1 = vector.shape_cast %0 : vector<1x8x128xf32> to vector<8x128xf32>
    %c0_2 = arith.constant 0 : index
    %c0_3 = arith.constant 0 : index
    %c0_4 = arith.constant 0 : index
    %2 = vector.load %arg2[%c0_2, %c0_3, %c0_4] : memref<1x8x8xf32, #tpu.memory_space<vmem>>, vector<1x8x8xf32>
    %3 = vector.shape_cast %2 : vector<1x8x8xf32> to vector<8x8xf32>
    %c0_5 = arith.constant 0 : index
    %c0_6 = arith.constant 0 : index
    %c0_7 = arith.constant 0 : index
    %4 = vector.load %arg3[%c0_5, %c0_6, %c0_7] : memref<2x1x128xf32, #tpu.memory_space<vmem>>, vector<1x1x128xf32>
    %5 = vector.shape_cast %4 : vector<1x1x128xf32> to vector<1x128xf32>
    %c0_8 = arith.constant 0 : index
    %c0_9 = arith.constant 0 : index
    %c0_10 = arith.constant 0 : index
    %6 = vector.load %arg4[%c0_8, %c0_9, %c0_10] : memref<2x1x128xf32, #tpu.memory_space<vmem>>, vector<1x1x128xf32>
    %7 = vector.shape_cast %6 : vector<1x1x128xf32> to vector<1x128xf32>
    %cst = arith.constant dense<0.000000e+00> : vector<8xf32>
    %8 = vector.multi_reduction <add>, %1, %cst [1] : vector<8x128xf32> to vector<8xf32>
    %9 = vector.shape_cast %8 : vector<8xf32> to vector<8x1xf32>
    %cst_11 = arith.constant 1.280000e+02 : f32
    %10 = vector.broadcast %cst_11 : f32 to vector<8x1xf32>
    %11 = arith.divf %9, %10 : vector<8x1xf32>
    %12 = vector.broadcast %11 : vector<8x1xf32> to vector<8x128xf32>
    %13 = arith.subf %1, %12 : vector<8x128xf32>
    %14 = arith.mulf %13, %13 : vector<8x128xf32>
    %cst_12 = arith.constant dense<0.000000e+00> : vector<8xf32>
    %15 = vector.multi_reduction <add>, %14, %cst_12 [1] : vector<8x128xf32> to vector<8xf32>
    %16 = vector.shape_cast %15 : vector<8xf32> to vector<8x1xf32>
    %cst_13 = arith.constant 1.270000e+02 : f32
    %17 = vector.broadcast %cst_13 : f32 to vector<8x1xf32>
    %18 = arith.divf %16, %17 : vector<8x1xf32>
    %19 = vector.broadcast %5 : vector<1x128xf32> to vector<8x128xf32>
    %20 = arith.mulf %19, %13 : vector<8x128xf32>
    %21 = math.sqrt %18 : vector<8x1xf32>
    %cst_14 = arith.constant 9.99999997E-7 : f32
    %22 = vector.broadcast %cst_14 : f32 to vector<8x1xf32>
    %23 = arith.addf %21, %22 : vector<8x1xf32>
    %24 = vector.broadcast %23 : vector<8x1xf32> to vector<8x128xf32>
    %25 = arith.divf %20, %24 : vector<8x128xf32>
    %26 = vector.broadcast %7 : vector<1x128xf32> to vector<8x128xf32>
    %27 = arith.addf %25, %26 : vector<8x128xf32>
    %28 = arith.truncf %27 : vector<8x128xf32> to vector<8x128xbf16>
    %29 = vector.shape_cast %28 : vector<8x128xbf16> to vector<1x8x128xbf16>
    %30 = vector.shape_cast %29 : vector<1x8x128xbf16> to vector<1x8x128xbf16>
    %31 = vector.broadcast %30 : vector<1x8x128xbf16> to vector<4x8x128xbf16>
    %c0_15 = arith.constant 0 : index
    %c0_16 = arith.constant 0 : index
    %c0_17 = arith.constant 0 : index
    %c0_18 = arith.constant 0 : index
    %32 = vector.load %arg5[%c0_15, %c0_16, %c0_17, %c0_18] : memref<2x4x128x96xbf16, #tpu.memory_space<vmem>>, vector<1x4x128x96xbf16>
    %33 = vector.shape_cast %32 : vector<1x4x128x96xbf16> to vector<4x128x96xbf16>
    "tpu.trace_start"() <{level = 10 : i32, message = "hsd,hdf->hsf"}> : () -> ()
    %cst_19 = arith.constant dense<0.000000e+00> : vector<4x8x96xf32>
    %34 = tpu.matmul %31, %33, %cst_19 {dimension_numbers = #tpu.dot_dimension_numbers<[2], [1], [1], [2], [0, 0, 0, 1, 1, 2], [0], [0]>} : vector<4x8x128xbf16>, vector<4x128x96xbf16>, vector<4x8x96xf32> -> vector<4x8x96xf32>
    "tpu.trace_stop"() : () -> ()
    %c0_20 = arith.constant 0 : index
    %c0_21 = arith.constant 0 : index
    %c0_22 = arith.constant 0 : index
    %c0_23 = arith.constant 0 : index
    %35 = vector.load %arg6[%c0_20, %c0_21, %c0_22, %c0_23] : memref<2x4x1x96xf32, #tpu.memory_space<vmem>>, vector<1x4x1x96xf32>
    %36 = vector.shape_cast %35 : vector<1x4x1x96xf32> to vector<4x1x96xf32>
    %37 = vector.broadcast %36 : vector<4x1x96xf32> to vector<4x8x96xf32>
    %38 = arith.addf %34, %37 : vector<4x8x96xf32>
    %39 = arith.truncf %38 : vector<4x8x96xf32> to vector<4x8x96xbf16>
    %40 = vector.extract_strided_slice %39 {offsets = [0, 0, 0], sizes = [4, 8, 32], strides = [1, 1, 1]} : vector<4x8x96xbf16> to vector<4x8x32xbf16>
    %41 = vector.extract_strided_slice %39 {offsets = [0, 0, 32], sizes = [4, 8, 32], strides = [1, 1, 1]} : vector<4x8x96xbf16> to vector<4x8x32xbf16>
    %42 = vector.extract_strided_slice %39 {offsets = [0, 0, 64], sizes = [4, 8, 32], strides = [1, 1, 1]} : vector<4x8x96xbf16> to vector<4x8x32xbf16>
    "tpu.trace_start"() <{level = 10 : i32, message = "hqd,hkd->hqk"}> : () -> ()
    %cst_24 = arith.constant dense<0.000000e+00> : vector<4x8x8xf32>
    %43 = tpu.matmul %40, %41, %cst_24 {dimension_numbers = #tpu.dot_dimension_numbers<[2], [2], [1], [1], [0, 0, 0, 1, 1, 1], [0], [0]>} : vector<4x8x32xbf16>, vector<4x8x32xbf16>, vector<4x8x8xf32> -> vector<4x8x8xf32>
    "tpu.trace_stop"() : () -> ()
    %44 = vector.shape_cast %3 : vector<8x8xf32> to vector<1x8x8xf32>
    %45 = vector.broadcast %44 : vector<1x8x8xf32> to vector<4x8x8xf32>
    %46 = arith.addf %43, %45 : vector<4x8x8xf32>
    %cst_25 = arith.constant dense<0xFF800000> : vector<4x8xf32>
    %47 = vector.multi_reduction <maximumf>, %46, %cst_25 [2] : vector<4x8x8xf32> to vector<4x8xf32>
    %48 = vector.shape_cast %47 : vector<4x8xf32> to vector<4x8x1xf32>
    %49 = vector.broadcast %48 : vector<4x8x1xf32> to vector<4x8x8xf32>
    %50 = arith.subf %46, %49 : vector<4x8x8xf32>
    %51 = math.exp %50 : vector<4x8x8xf32>
    %cst_26 = arith.constant dense<0.000000e+00> : vector<4x8xf32>
    %52 = vector.multi_reduction <add>, %51, %cst_26 [2] : vector<4x8x8xf32> to vector<4x8xf32>
    %53 = vector.shape_cast %52 : vector<4x8xf32> to vector<4x8x1xf32>
    %54 = tpu.reciprocal %53 {approx = true} : vector<4x8x1xf32> -> vector<4x8x1xf32>
    %55 = vector.broadcast %54 : vector<4x8x1xf32> to vector<4x8x8xf32>
    %56 = arith.mulf %51, %55 : vector<4x8x8xf32>
    %57 = arith.truncf %56 : vector<4x8x8xf32> to vector<4x8x8xbf16>
    "tpu.trace_start"() <{level = 10 : i32, message = "hqk,hkd->hqd"}> : () -> ()
    %cst_27 = arith.constant dense<0.000000e+00> : vector<4x8x32xf32>
    %58 = tpu.matmul %57, %42, %cst_27 {dimension_numbers = #tpu.dot_dimension_numbers<[2], [1], [1], [2], [0, 0, 0, 1, 1, 2], [0], [0]>} : vector<4x8x8xbf16>, vector<4x8x32xbf16>, vector<4x8x32xf32> -> vector<4x8x32xf32>
    "tpu.trace_stop"() : () -> ()
    %59 = arith.truncf %58 : vector<4x8x32xf32> to vector<4x8x32xbf16>
    %c0_28 = arith.constant 0 : index
    %c0_29 = arith.constant 0 : index
    %c0_30 = arith.constant 0 : index
    %c0_31 = arith.constant 0 : index
    %60 = vector.load %arg7[%c0_28, %c0_29, %c0_30, %c0_31] : memref<2x4x32x128xbf16, #tpu.memory_space<vmem>>, vector<1x4x32x128xbf16>
    %61 = vector.shape_cast %60 : vector<1x4x32x128xbf16> to vector<4x32x128xbf16>
    "tpu.trace_start"() <{level = 10 : i32, message = "hsd,hdf->hsf"}> : () -> ()
    %cst_32 = arith.constant dense<0.000000e+00> : vector<4x8x128xf32>
    %62 = tpu.matmul %59, %61, %cst_32 {dimension_numbers = #tpu.dot_dimension_numbers<[2], [1], [1], [2], [0, 0, 0, 1, 1, 2], [0], [0]>} : vector<4x8x32xbf16>, vector<4x32x128xbf16>, vector<4x8x128xf32> -> vector<4x8x128xf32>
    "tpu.trace_stop"() : () -> ()
    %cst_33 = arith.constant dense<0.000000e+00> : vector<8x128xf32>
    %63 = vector.multi_reduction <add>, %62, %cst_33 [0] : vector<4x8x128xf32> to vector<8x128xf32>
    %64 = arith.addf %1, %63 : vector<8x128xf32>
    %c0_34 = arith.constant 0 : index
    %c0_35 = arith.constant 0 : index
    %c0_36 = arith.constant 0 : index
    %65 = vector.load %arg8[%c0_34, %c0_35, %c0_36] : memref<2x1x128xf32, #tpu.memory_space<vmem>>, vector<1x1x128xf32>
    %66 = vector.shape_cast %65 : vector<1x1x128xf32> to vector<1x128xf32>
    %67 = vector.broadcast %66 : vector<1x128xf32> to vector<8x128xf32>
    %68 = arith.addf %64, %67 : vector<8x128xf32>
    %c0_37 = arith.constant 0 : index
    %c0_38 = arith.constant 0 : index
    %c0_39 = arith.constant 0 : index
    %69 = vector.load %arg9[%c0_37, %c0_38, %c0_39] : memref<2x1x128xf32, #tpu.memory_space<vmem>>, vector<1x1x128xf32>
    %70 = vector.shape_cast %69 : vector<1x1x128xf32> to vector<1x128xf32>
    %c0_40 = arith.constant 0 : index
    %c0_41 = arith.constant 0 : index
    %c0_42 = arith.constant 0 : index
    %71 = vector.load %arg10[%c0_40, %c0_41, %c0_42] : memref<2x1x128xf32, #tpu.memory_space<vmem>>, vector<1x1x128xf32>
    %72 = vector.shape_cast %71 : vector<1x1x128xf32> to vector<1x128xf32>
    %cst_43 = arith.constant dense<0.000000e+00> : vector<8xf32>
    %73 = vector.multi_reduction <add>, %68, %cst_43 [1] : vector<8x128xf32> to vector<8xf32>
    %74 = vector.shape_cast %73 : vector<8xf32> to vector<8x1xf32>
    %cst_44 = arith.constant 1.280000e+02 : f32
    %75 = vector.broadcast %cst_44 : f32 to vector<8x1xf32>
    %76 = arith.divf %74, %75 : vector<8x1xf32>
    %77 = vector.broadcast %76 : vector<8x1xf32> to vector<8x128xf32>
    %78 = arith.subf %68, %77 : vector<8x128xf32>
    %79 = arith.mulf %78, %78 : vector<8x128xf32>
    %cst_45 = arith.constant dense<0.000000e+00> : vector<8xf32>
    %80 = vector.multi_reduction <add>, %79, %cst_45 [1] : vector<8x128xf32> to vector<8xf32>
    %81 = vector.shape_cast %80 : vector<8xf32> to vector<8x1xf32>
    %cst_46 = arith.constant 1.270000e+02 : f32
    %82 = vector.broadcast %cst_46 : f32 to vector<8x1xf32>
    %83 = arith.divf %81, %82 : vector<8x1xf32>
    %84 = vector.broadcast %70 : vector<1x128xf32> to vector<8x128xf32>
    %85 = arith.mulf %84, %78 : vector<8x128xf32>
    %86 = math.sqrt %83 : vector<8x1xf32>
    %cst_47 = arith.constant 9.99999997E-7 : f32
    %87 = vector.broadcast %cst_47 : f32 to vector<8x1xf32>
    %88 = arith.addf %86, %87 : vector<8x1xf32>
    %89 = vector.broadcast %88 : vector<8x1xf32> to vector<8x128xf32>
    %90 = arith.divf %85, %89 : vector<8x128xf32>
    %91 = vector.broadcast %72 : vector<1x128xf32> to vector<8x128xf32>
    %92 = arith.addf %90, %91 : vector<8x128xf32>
    %93 = arith.truncf %92 : vector<8x128xf32> to vector<8x128xbf16>
    %c0_48 = arith.constant 0 : index
    %c0_49 = arith.constant 0 : index
    %c0_50 = arith.constant 0 : index
    %94 = vector.load %arg11[%c0_48, %c0_49, %c0_50] : memref<2x128x128xbf16, #tpu.memory_space<vmem>>, vector<1x128x128xbf16>
    %95 = vector.shape_cast %94 : vector<1x128x128xbf16> to vector<128x128xbf16>
    %cst_51 = arith.constant dense<0.000000e+00> : vector<8x128xf32>
    %96 = tpu.matmul %93, %95, %cst_51 {dimension_numbers = #tpu.dot_dimension_numbers<[1], [0], [0], [1], [0, 0, 1, 1], [], []>} : vector<8x128xbf16>, vector<128x128xbf16>, vector<8x128xf32> -> vector<8x128xf32>
    %c0_52 = arith.constant 0 : index
    %c0_53 = arith.constant 0 : index
    %c0_54 = arith.constant 0 : index
    %97 = vector.load %arg12[%c0_52, %c0_53, %c0_54] : memref<2x1x128xf32, #tpu.memory_space<vmem>>, vector<1x1x128xf32>
    %98 = vector.shape_cast %97 : vector<1x1x128xf32> to vector<1x128xf32>
    %99 = vector.broadcast %98 : vector<1x128xf32> to vector<8x128xf32>
    %100 = arith.addf %96, %99 : vector<8x128xf32>
    %cst_55 = arith.constant 0.000000e+00 : f32
    %101 = vector.broadcast %cst_55 : f32 to vector<8x128xf32>
    %102 = arith.maximumf %100, %101 : vector<8x128xf32>
    %103 = arith.truncf %102 : vector<8x128xf32> to vector<8x128xbf16>
    %c0_56 = arith.constant 0 : index
    %c0_57 = arith.constant 0 : index
    %c0_58 = arith.constant 0 : index
    %104 = vector.load %arg13[%c0_56, %c0_57, %c0_58] : memref<2x128x128xbf16, #tpu.memory_space<vmem>>, vector<1x128x128xbf16>
    %105 = vector.shape_cast %104 : vector<1x128x128xbf16> to vector<128x128xbf16>
    %cst_59 = arith.constant dense<0.000000e+00> : vector<8x128xf32>
    %106 = tpu.matmul %103, %105, %cst_59 {dimension_numbers = #tpu.dot_dimension_numbers<[1], [0], [0], [1], [0, 0, 1, 1], [], []>} : vector<8x128xbf16>, vector<128x128xbf16>, vector<8x128xf32> -> vector<8x128xf32>
    %c0_60 = arith.constant 0 : index
    %c0_61 = arith.constant 0 : index
    %c0_62 = arith.constant 0 : index
    %107 = vector.load %arg14[%c0_60, %c0_61, %c0_62] : memref<2x1x128xf32, #tpu.memory_space<vmem>>, vector<1x1x128xf32>
    %108 = vector.shape_cast %107 : vector<1x1x128xf32> to vector<1x128xf32>
    %109 = vector.broadcast %108 : vector<1x128xf32> to vector<8x128xf32>
    %110 = arith.addf %106, %109 : vector<8x128xf32>
    %111 = arith.addf %68, %110 : vector<8x128xf32>
    %c1 = arith.constant 1 : index
    %c0_63 = arith.constant 0 : index
    %c0_64 = arith.constant 0 : index
    %112 = vector.load %arg3[%c1, %c0_63, %c0_64] : memref<2x1x128xf32, #tpu.memory_space<vmem>>, vector<1x1x128xf32>
    %113 = vector.shape_cast %112 : vector<1x1x128xf32> to vector<1x128xf32>
    %c1_65 = arith.constant 1 : index
    %c0_66 = arith.constant 0 : index
    %c0_67 = arith.constant 0 : index
    %114 = vector.load %arg4[%c1_65, %c0_66, %c0_67] : memref<2x1x128xf32, #tpu.memory_space<vmem>>, vector<1x1x128xf32>
    %115 = vector.shape_cast %114 : vector<1x1x128xf32> to vector<1x128xf32>
    %cst_68 = arith.constant dense<0.000000e+00> : vector<8xf32>
    %116 = vector.multi_reduction <add>, %111, %cst_68 [1] : vector<8x128xf32> to vector<8xf32>
    %117 = vector.shape_cast %116 : vector<8xf32> to vector<8x1xf32>
    %cst_69 = arith.constant 1.280000e+02 : f32
    %118 = vector.broadcast %cst_69 : f32 to vector<8x1xf32>
    %119 = arith.divf %117, %118 : vector<8x1xf32>
    %120 = vector.broadcast %119 : vector<8x1xf32> to vector<8x128xf32>
    %121 = arith.subf %111, %120 : vector<8x128xf32>
    %122 = arith.mulf %121, %121 : vector<8x128xf32>
    %cst_70 = arith.constant dense<0.000000e+00> : vector<8xf32>
    %123 = vector.multi_reduction <add>, %122, %cst_70 [1] : vector<8x128xf32> to vector<8xf32>
    %124 = vector.shape_cast %123 : vector<8xf32> to vector<8x1xf32>
    %cst_71 = arith.constant 1.270000e+02 : f32
    %125 = vector.broadcast %cst_71 : f32 to vector<8x1xf32>
    %126 = arith.divf %124, %125 : vector<8x1xf32>
    %127 = vector.broadcast %113 : vector<1x128xf32> to vector<8x128xf32>
    %128 = arith.mulf %127, %121 : vector<8x128xf32>
    %129 = math.sqrt %126 : vector<8x1xf32>
    %cst_72 = arith.constant 9.99999997E-7 : f32
    %130 = vector.broadcast %cst_72 : f32 to vector<8x1xf32>
    %131 = arith.addf %129, %130 : vector<8x1xf32>
    %132 = vector.broadcast %131 : vector<8x1xf32> to vector<8x128xf32>
    %133 = arith.divf %128, %132 : vector<8x128xf32>
    %134 = vector.broadcast %115 : vector<1x128xf32> to vector<8x128xf32>
    %135 = arith.addf %133, %134 : vector<8x128xf32>
    %136 = arith.truncf %135 : vector<8x128xf32> to vector<8x128xbf16>
    %137 = vector.shape_cast %136 : vector<8x128xbf16> to vector<1x8x128xbf16>
    %138 = vector.shape_cast %137 : vector<1x8x128xbf16> to vector<1x8x128xbf16>
    %139 = vector.broadcast %138 : vector<1x8x128xbf16> to vector<4x8x128xbf16>
    %c1_73 = arith.constant 1 : index
    %c0_74 = arith.constant 0 : index
    %c0_75 = arith.constant 0 : index
    %c0_76 = arith.constant 0 : index
    %140 = vector.load %arg5[%c1_73, %c0_74, %c0_75, %c0_76] : memref<2x4x128x96xbf16, #tpu.memory_space<vmem>>, vector<1x4x128x96xbf16>
    %141 = vector.shape_cast %140 : vector<1x4x128x96xbf16> to vector<4x128x96xbf16>
    "tpu.trace_start"() <{level = 10 : i32, message = "hsd,hdf->hsf"}> : () -> ()
    %cst_77 = arith.constant dense<0.000000e+00> : vector<4x8x96xf32>
    %142 = tpu.matmul %139, %141, %cst_77 {dimension_numbers = #tpu.dot_dimension_numbers<[2], [1], [1], [2], [0, 0, 0, 1, 1, 2], [0], [0]>} : vector<4x8x128xbf16>, vector<4x128x96xbf16>, vector<4x8x96xf32> -> vector<4x8x96xf32>
    "tpu.trace_stop"() : () -> ()
    %c1_78 = arith.constant 1 : index
    %c0_79 = arith.constant 0 : index
    %c0_80 = arith.constant 0 : index
    %c0_81 = arith.constant 0 : index
    %143 = vector.load %arg6[%c1_78, %c0_79, %c0_80, %c0_81] : memref<2x4x1x96xf32, #tpu.memory_space<vmem>>, vector<1x4x1x96xf32>
    %144 = vector.shape_cast %143 : vector<1x4x1x96xf32> to vector<4x1x96xf32>
    %145 = vector.broadcast %144 : vector<4x1x96xf32> to vector<4x8x96xf32>
    %146 = arith.addf %142, %145 : vector<4x8x96xf32>
    %147 = arith.truncf %146 : vector<4x8x96xf32> to vector<4x8x96xbf16>
    %148 = vector.extract_strided_slice %147 {offsets = [0, 0, 0], sizes = [4, 8, 32], strides = [1, 1, 1]} : vector<4x8x96xbf16> to vector<4x8x32xbf16>
    %149 = vector.extract_strided_slice %147 {offsets = [0, 0, 32], sizes = [4, 8, 32], strides = [1, 1, 1]} : vector<4x8x96xbf16> to vector<4x8x32xbf16>
    %150 = vector.extract_strided_slice %147 {offsets = [0, 0, 64], sizes = [4, 8, 32], strides = [1, 1, 1]} : vector<4x8x96xbf16> to vector<4x8x32xbf16>
    "tpu.trace_start"() <{level = 10 : i32, message = "hqd,hkd->hqk"}> : () -> ()
    %cst_82 = arith.constant dense<0.000000e+00> : vector<4x8x8xf32>
    %151 = tpu.matmul %148, %149, %cst_82 {dimension_numbers = #tpu.dot_dimension_numbers<[2], [2], [1], [1], [0, 0, 0, 1, 1, 1], [0], [0]>} : vector<4x8x32xbf16>, vector<4x8x32xbf16>, vector<4x8x8xf32> -> vector<4x8x8xf32>
    "tpu.trace_stop"() : () -> ()
    %152 = vector.shape_cast %3 : vector<8x8xf32> to vector<1x8x8xf32>
    %153 = vector.broadcast %152 : vector<1x8x8xf32> to vector<4x8x8xf32>
    %154 = arith.addf %151, %153 : vector<4x8x8xf32>
    %cst_83 = arith.constant dense<0xFF800000> : vector<4x8xf32>
    %155 = vector.multi_reduction <maximumf>, %154, %cst_83 [2] : vector<4x8x8xf32> to vector<4x8xf32>
    %156 = vector.shape_cast %155 : vector<4x8xf32> to vector<4x8x1xf32>
    %157 = vector.broadcast %156 : vector<4x8x1xf32> to vector<4x8x8xf32>
    %158 = arith.subf %154, %157 : vector<4x8x8xf32>
    %159 = math.exp %158 : vector<4x8x8xf32>
    %cst_84 = arith.constant dense<0.000000e+00> : vector<4x8xf32>
    %160 = vector.multi_reduction <add>, %159, %cst_84 [2] : vector<4x8x8xf32> to vector<4x8xf32>
    %161 = vector.shape_cast %160 : vector<4x8xf32> to vector<4x8x1xf32>
    %162 = tpu.reciprocal %161 {approx = true} : vector<4x8x1xf32> -> vector<4x8x1xf32>
    %163 = vector.broadcast %162 : vector<4x8x1xf32> to vector<4x8x8xf32>
    %164 = arith.mulf %159, %163 : vector<4x8x8xf32>
    %165 = arith.truncf %164 : vector<4x8x8xf32> to vector<4x8x8xbf16>
    "tpu.trace_start"() <{level = 10 : i32, message = "hqk,hkd->hqd"}> : () -> ()
    %cst_85 = arith.constant dense<0.000000e+00> : vector<4x8x32xf32>
    %166 = tpu.matmul %165, %150, %cst_85 {dimension_numbers = #tpu.dot_dimension_numbers<[2], [1], [1], [2], [0, 0, 0, 1, 1, 2], [0], [0]>} : vector<4x8x8xbf16>, vector<4x8x32xbf16>, vector<4x8x32xf32> -> vector<4x8x32xf32>
    "tpu.trace_stop"() : () -> ()
    %167 = arith.truncf %166 : vector<4x8x32xf32> to vector<4x8x32xbf16>
    %c1_86 = arith.constant 1 : index
    %c0_87 = arith.constant 0 : index
    %c0_88 = arith.constant 0 : index
    %c0_89 = arith.constant 0 : index
    %168 = vector.load %arg7[%c1_86, %c0_87, %c0_88, %c0_89] : memref<2x4x32x128xbf16, #tpu.memory_space<vmem>>, vector<1x4x32x128xbf16>
    %169 = vector.shape_cast %168 : vector<1x4x32x128xbf16> to vector<4x32x128xbf16>
    "tpu.trace_start"() <{level = 10 : i32, message = "hsd,hdf->hsf"}> : () -> ()
    %cst_90 = arith.constant dense<0.000000e+00> : vector<4x8x128xf32>
    %170 = tpu.matmul %167, %169, %cst_90 {dimension_numbers = #tpu.dot_dimension_numbers<[2], [1], [1], [2], [0, 0, 0, 1, 1, 2], [0], [0]>} : vector<4x8x32xbf16>, vector<4x32x128xbf16>, vector<4x8x128xf32> -> vector<4x8x128xf32>
    "tpu.trace_stop"() : () -> ()
    %cst_91 = arith.constant dense<0.000000e+00> : vector<8x128xf32>
    %171 = vector.multi_reduction <add>, %170, %cst_91 [0] : vector<4x8x128xf32> to vector<8x128xf32>
    %172 = arith.addf %111, %171 : vector<8x128xf32>
    %c1_92 = arith.constant 1 : index
    %c0_93 = arith.constant 0 : index
    %c0_94 = arith.constant 0 : index
    %173 = vector.load %arg8[%c1_92, %c0_93, %c0_94] : memref<2x1x128xf32, #tpu.memory_space<vmem>>, vector<1x1x128xf32>
    %174 = vector.shape_cast %173 : vector<1x1x128xf32> to vector<1x128xf32>
    %175 = vector.broadcast %174 : vector<1x128xf32> to vector<8x128xf32>
    %176 = arith.addf %172, %175 : vector<8x128xf32>
    %c1_95 = arith.constant 1 : index
    %c0_96 = arith.constant 0 : index
    %c0_97 = arith.constant 0 : index
    %177 = vector.load %arg9[%c1_95, %c0_96, %c0_97] : memref<2x1x128xf32, #tpu.memory_space<vmem>>, vector<1x1x128xf32>
    %178 = vector.shape_cast %177 : vector<1x1x128xf32> to vector<1x128xf32>
    %c1_98 = arith.constant 1 : index
    %c0_99 = arith.constant 0 : index
    %c0_100 = arith.constant 0 : index
    %179 = vector.load %arg10[%c1_98, %c0_99, %c0_100] : memref<2x1x128xf32, #tpu.memory_space<vmem>>, vector<1x1x128xf32>
    %180 = vector.shape_cast %179 : vector<1x1x128xf32> to vector<1x128xf32>
    %cst_101 = arith.constant dense<0.000000e+00> : vector<8xf32>
    %181 = vector.multi_reduction <add>, %176, %cst_101 [1] : vector<8x128xf32> to vector<8xf32>
    %182 = vector.shape_cast %181 : vector<8xf32> to vector<8x1xf32>
    %cst_102 = arith.constant 1.280000e+02 : f32
    %183 = vector.broadcast %cst_102 : f32 to vector<8x1xf32>
    %184 = arith.divf %182, %183 : vector<8x1xf32>
    %185 = vector.broadcast %184 : vector<8x1xf32> to vector<8x128xf32>
    %186 = arith.subf %176, %185 : vector<8x128xf32>
    %187 = arith.mulf %186, %186 : vector<8x128xf32>
    %cst_103 = arith.constant dense<0.000000e+00> : vector<8xf32>
    %188 = vector.multi_reduction <add>, %187, %cst_103 [1] : vector<8x128xf32> to vector<8xf32>
    %189 = vector.shape_cast %188 : vector<8xf32> to vector<8x1xf32>
    %cst_104 = arith.constant 1.270000e+02 : f32
    %190 = vector.broadcast %cst_104 : f32 to vector<8x1xf32>
    %191 = arith.divf %189, %190 : vector<8x1xf32>
    %192 = vector.broadcast %178 : vector<1x128xf32> to vector<8x128xf32>
    %193 = arith.mulf %192, %186 : vector<8x128xf32>
    %194 = math.sqrt %191 : vector<8x1xf32>
    %cst_105 = arith.constant 9.99999997E-7 : f32
    %195 = vector.broadcast %cst_105 : f32 to vector<8x1xf32>
    %196 = arith.addf %194, %195 : vector<8x1xf32>
    %197 = vector.broadcast %196 : vector<8x1xf32> to vector<8x128xf32>
    %198 = arith.divf %193, %197 : vector<8x128xf32>
    %199 = vector.broadcast %180 : vector<1x128xf32> to vector<8x128xf32>
    %200 = arith.addf %198, %199 : vector<8x128xf32>
    %201 = arith.truncf %200 : vector<8x128xf32> to vector<8x128xbf16>
    %c1_106 = arith.constant 1 : index
    %c0_107 = arith.constant 0 : index
    %c0_108 = arith.constant 0 : index
    %202 = vector.load %arg11[%c1_106, %c0_107, %c0_108] : memref<2x128x128xbf16, #tpu.memory_space<vmem>>, vector<1x128x128xbf16>
    %203 = vector.shape_cast %202 : vector<1x128x128xbf16> to vector<128x128xbf16>
    %cst_109 = arith.constant dense<0.000000e+00> : vector<8x128xf32>
    %204 = tpu.matmul %201, %203, %cst_109 {dimension_numbers = #tpu.dot_dimension_numbers<[1], [0], [0], [1], [0, 0, 1, 1], [], []>} : vector<8x128xbf16>, vector<128x128xbf16>, vector<8x128xf32> -> vector<8x128xf32>
    %c1_110 = arith.constant 1 : index
    %c0_111 = arith.constant 0 : index
    %c0_112 = arith.constant 0 : index
    %205 = vector.load %arg12[%c1_110, %c0_111, %c0_112] : memref<2x1x128xf32, #tpu.memory_space<vmem>>, vector<1x1x128xf32>
    %206 = vector.shape_cast %205 : vector<1x1x128xf32> to vector<1x128xf32>
    %207 = vector.broadcast %206 : vector<1x128xf32> to vector<8x128xf32>
    %208 = arith.addf %204, %207 : vector<8x128xf32>
    %cst_113 = arith.constant 0.000000e+00 : f32
    %209 = vector.broadcast %cst_113 : f32 to vector<8x128xf32>
    %210 = arith.maximumf %208, %209 : vector<8x128xf32>
    %211 = arith.truncf %210 : vector<8x128xf32> to vector<8x128xbf16>
    %c1_114 = arith.constant 1 : index
    %c0_115 = arith.constant 0 : index
    %c0_116 = arith.constant 0 : index
    %212 = vector.load %arg13[%c1_114, %c0_115, %c0_116] : memref<2x128x128xbf16, #tpu.memory_space<vmem>>, vector<1x128x128xbf16>
    %213 = vector.shape_cast %212 : vector<1x128x128xbf16> to vector<128x128xbf16>
    %cst_117 = arith.constant dense<0.000000e+00> : vector<8x128xf32>
    %214 = tpu.matmul %211, %213, %cst_117 {dimension_numbers = #tpu.dot_dimension_numbers<[1], [0], [0], [1], [0, 0, 1, 1], [], []>} : vector<8x128xbf16>, vector<128x128xbf16>, vector<8x128xf32> -> vector<8x128xf32>
    %c1_118 = arith.constant 1 : index
    %c0_119 = arith.constant 0 : index
    %c0_120 = arith.constant 0 : index
    %215 = vector.load %arg14[%c1_118, %c0_119, %c0_120] : memref<2x1x128xf32, #tpu.memory_space<vmem>>, vector<1x1x128xf32>
    %216 = vector.shape_cast %215 : vector<1x1x128xf32> to vector<1x128xf32>
    %217 = vector.broadcast %216 : vector<1x128xf32> to vector<8x128xf32>
    %218 = arith.addf %214, %217 : vector<8x128xf32>
    %219 = arith.addf %176, %218 : vector<8x128xf32>
    %c0_121 = arith.constant 0 : index
    %c0_122 = arith.constant 0 : index
    %220 = vector.load %arg15[%c0_121, %c0_122] : memref<1x128xf32, #tpu.memory_space<vmem>>, vector<1x128xf32>
    %c0_123 = arith.constant 0 : index
    %c0_124 = arith.constant 0 : index
    %221 = vector.load %arg16[%c0_123, %c0_124] : memref<1x128xf32, #tpu.memory_space<vmem>>, vector<1x128xf32>
    %cst_125 = arith.constant dense<0.000000e+00> : vector<8xf32>
    %222 = vector.multi_reduction <add>, %219, %cst_125 [1] : vector<8x128xf32> to vector<8xf32>
    %223 = vector.shape_cast %222 : vector<8xf32> to vector<8x1xf32>
    %cst_126 = arith.constant 1.280000e+02 : f32
    %224 = vector.broadcast %cst_126 : f32 to vector<8x1xf32>
    %225 = arith.divf %223, %224 : vector<8x1xf32>
    %226 = vector.broadcast %225 : vector<8x1xf32> to vector<8x128xf32>
    %227 = arith.subf %219, %226 : vector<8x128xf32>
    %228 = arith.mulf %227, %227 : vector<8x128xf32>
    %cst_127 = arith.constant dense<0.000000e+00> : vector<8xf32>
    %229 = vector.multi_reduction <add>, %228, %cst_127 [1] : vector<8x128xf32> to vector<8xf32>
    %230 = vector.shape_cast %229 : vector<8xf32> to vector<8x1xf32>
    %cst_128 = arith.constant 1.270000e+02 : f32
    %231 = vector.broadcast %cst_128 : f32 to vector<8x1xf32>
    %232 = arith.divf %230, %231 : vector<8x1xf32>
    %233 = vector.broadcast %220 : vector<1x128xf32> to vector<8x128xf32>
    %234 = arith.mulf %233, %227 : vector<8x128xf32>
    %235 = math.sqrt %232 : vector<8x1xf32>
    %cst_129 = arith.constant 9.99999997E-7 : f32
    %236 = vector.broadcast %cst_129 : f32 to vector<8x1xf32>
    %237 = arith.addf %235, %236 : vector<8x1xf32>
    %238 = vector.broadcast %237 : vector<8x1xf32> to vector<8x128xf32>
    %239 = arith.divf %234, %238 : vector<8x128xf32>
    %240 = vector.broadcast %221 : vector<1x128xf32> to vector<8x128xf32>
    %241 = arith.addf %239, %240 : vector<8x128xf32>
    %c0_130 = arith.constant 0 : index
    %c0_131 = arith.constant 0 : index
    %c0_132 = arith.constant 0 : index
    %242 = vector.load %arg17[%c0_130, %c0_131, %c0_132] : memref<1x8x128xf32, #tpu.memory_space<vmem>>, vector<1x8x128xf32>
    %243 = vector.shape_cast %242 : vector<1x8x128xf32> to vector<8x128xf32>
    %244 = vector.shape_cast %241 : vector<8x128xf32> to vector<1x8x128xf32>
    tpu.vector_store %arg17[%c0_130, %c0_131, %c0_132], %244 {strides = array<i32>} : memref<1x8x128xf32, #tpu.memory_space<vmem>>, vector<1x8x128xf32>,
    return
  }
  func.func @transform_0(%arg0: i32) -> (i32, i32, i32) {
    %c0_i32 = arith.constant 0 : i32
    %c0_i32_0 = arith.constant 0 : i32
    %c0_i32_1 = arith.constant 0 : i32
    return %arg0, %c0_i32, %c0_i32_0 : i32, i32, i32
  }
  func.func @transform_1(%arg0: i32) -> (i32, i32, i32) {
    %c0_i32 = arith.constant 0 : i32
    %c0_i32_0 = arith.constant 0 : i32
    %c0_i32_1 = arith.constant 0 : i32
    return %arg0, %c0_i32, %c0_i32_0 : i32, i32, i32
  }
  func.func @transform_2(%arg0: i32) -> (i32, i32, i32) {
    %c0_i32 = arith.constant 0 : i32
    %c0_i32_0 = arith.constant 0 : i32
    %c0_i32_1 = arith.constant 0 : i32
    %c0_i32_2 = arith.constant 0 : i32
    return %c0_i32, %c0_i32_0, %c0_i32_1 : i32, i32, i32
  }
  func.func @transform_3(%arg0: i32) -> (i32, i32, i32) {
    %c0_i32 = arith.constant 0 : i32
    %c0_i32_0 = arith.constant 0 : i32
    %c0_i32_1 = arith.constant 0 : i32
    %c0_i32_2 = arith.constant 0 : i32
    return %c0_i32, %c0_i32_0, %c0_i32_1 : i32, i32, i32
  }
  func.func @transform_4(%arg0: i32) -> (i32, i32, i32, i32) {
    %c0_i32 = arith.constant 0 : i32
    %c0_i32_0 = arith.constant 0 : i32
    %c0_i32_1 = arith.constant 0 : i32
    %c0_i32_2 = arith.constant 0 : i32
    %c0_i32_3 = arith.constant 0 : i32
    return %c0_i32, %c0_i32_0, %c0_i32_1, %c0_i32_2 : i32, i32, i32, i32
  }
  func.func @transform_5(%arg0: i32) -> (i32, i32, i32, i32) {
    %c0_i32 = arith.constant 0 : i32
    %c0_i32_0 = arith.constant 0 : i32
    %c0_i32_1 = arith.constant 0 : i32
    %c0_i32_2 = arith.constant 0 : i32
    %c0_i32_3 = arith.constant 0 : i32
    return %c0_i32, %c0_i32_0, %c0_i32_1, %c0_i32_2 : i32, i32, i32, i32
  }
  func.func @transform_6(%arg0: i32) -> (i32, i32, i32, i32) {
    %c0_i32 = arith.constant 0 : i32
    %c0_i32_0 = arith.constant 0 : i32
    %c0_i32_1 = arith.constant 0 : i32
    %c0_i32_2 = arith.constant 0 : i32
    %c0_i32_3 = arith.constant 0 : i32
    return %c0_i32, %c0_i32_0, %c0_i32_1, %c0_i32_2 : i32, i32, i32, i32
  }
  func.func @transform_7(%arg0: i32) -> (i32, i32, i32) {
    %c0_i32 = arith.constant 0 : i32
    %c0_i32_0 = arith.constant 0 : i32
    %c0_i32_1 = arith.constant 0 : i32
    %c0_i32_2 = arith.constant 0 : i32
    return %c0_i32, %c0_i32_0, %c0_i32_1 : i32, i32, i32
  }
  func.func @transform_8(%arg0: i32) -> (i32, i32, i32) {
    %c0_i32 = arith.constant 0 : i32
    %c0_i32_0 = arith.constant 0 : i32
    %c0_i32_1 = arith.constant 0 : i32
    %c0_i32_2 = arith.constant 0 : i32
    return %c0_i32, %c0_i32_0, %c0_i32_1 : i32, i32, i32
  }
  func.func @transform_9(%arg0: i32) -> (i32, i32, i32) {
    %c0_i32 = arith.constant 0 : i32
    %c0_i32_0 = arith.constant 0 : i32
    %c0_i32_1 = arith.constant 0 : i32
    %c0_i32_2 = arith.constant 0 : i32
    return %c0_i32, %c0_i32_0, %c0_i32_1 : i32, i32, i32
  }
  func.func @transform_10(%arg0: i32) -> (i32, i32, i32) {
    %c0_i32 = arith.constant 0 : i32
    %c0_i32_0 = arith.constant 0 : i32
    %c0_i32_1 = arith.constant 0 : i32
    %c0_i32_2 = arith.constant 0 : i32
    return %c0_i32, %c0_i32_0, %c0_i32_1 : i32, i32, i32
  }
  func.func @transform_11(%arg0: i32) -> (i32, i32, i32) {
    %c0_i32 = arith.constant 0 : i32
    %c0_i32_0 = arith.constant 0 : i32
    %c0_i32_1 = arith.constant 0 : i32
    %c0_i32_2 = arith.constant 0 : i32
    return %c0_i32, %c0_i32_0, %c0_i32_1 : i32, i32, i32
  }
  func.func @transform_12(%arg0: i32) -> (i32, i32, i32) {
    %c0_i32 = arith.constant 0 : i32
    %c0_i32_0 = arith.constant 0 : i32
    %c0_i32_1 = arith.constant 0 : i32
    %c0_i32_2 = arith.constant 0 : i32
    return %c0_i32, %c0_i32_0, %c0_i32_1 : i32, i32, i32
  }
  func.func @transform_13(%arg0: i32) -> (i32, i32, i32) {
    %c0_i32 = arith.constant 0 : i32
    %c0_i32_0 = arith.constant 0 : i32
    %c0_i32_1 = arith.constant 0 : i32
    %c0_i32_2 = arith.constant 0 : i32
    return %c0_i32, %c0_i32_0, %c0_i32_1 : i32, i32, i32
  }
  func.func @transform_14(%arg0: i32) -> (i32, i32) {
    %c0_i32 = arith.constant 0 : i32
    %c0_i32_0 = arith.constant 0 : i32
    %c0_i32_1 = arith.constant 0 : i32
    return %c0_i32, %c0_i32_0 : i32, i32
  }
  func.func @transform_15(%arg0: i32) -> (i32, i32) {
    %c0_i32 = arith.constant 0 : i32
    %c0_i32_0 = arith.constant 0 : i32
    %c0_i32_1 = arith.constant 0 : i32
    return %c0_i32, %c0_i32_0 : i32, i32
  }
  func.func @transform_16(%arg0: i32) -> (i32, i32, i32) {
    %c0_i32 = arith.constant 0 : i32
    %c0_i32_0 = arith.constant 0 : i32
    %c0_i32_1 = arith.constant 0 : i32
    return %arg0, %c0_i32, %c0_i32_0 : i32, i32, i32
  }
}

</mosaic_0001>

<bundles_post_ra>
// kernel: pallas_encoder.1
= control target key start
LH: loop header
LB: loop body
LE: loop exit
PB: predicated region body
PF: predicated region fallthrough
CT: control target
= control target key end

     0   :  { %s4255_s0 = inlined_call_operand.vmem [shape: f32[2,8,128], index: 0, kind: input, shape index: {}]   ;;  %s4256_s1 = inlined_call_operand.vmem [shape: f32[2,8,8], index: 1, kind: input, shape index: {}]   ;;  %s4257_s2 = inlined_call_operand.vmem [shape: f32[2,1,128], index: 2, kind: input, shape index: {}]   ;;  %s4258_s3 = inlined_call_operand.vmem [shape: f32[2,1,128], index: 3, kind: input, shape index: {}]   ;;  %s4259_s4 = inlined_call_operand.vmem [shape: bf16[2,4,128,96], index: 4, kind: input, shape index: {}]   ;;  %s4260_s5 = inlined_call_operand.vmem [shape: f32[2,4,1,96], index: 5, kind: input, shape index: {}]   ;;  %s4261_s6 = inlined_call_operand.vmem [shape: bf16[2,4,32,128], index: 6, kind: input, shape index: {}]   ;;  %s4262_s7 = inlined_call_operand.vmem [shape: f32[2,1,128], index: 7, kind: input, shape index: {}]   ;;  %s4263_s8 = inlined_call_operand.vmem [shape: f32[2,1,128], index: 8, kind: input, shape index: {}]   ;;  %s4264_s9 = inlined_call_operand.vmem [shape: f32[2,1,128], index: 9, kind: input, shape index: {}]   ;;  %s4265_s10 = inlined_call_operand.vmem [shape: bf16[2,128,128], index: 10, kind: input, shape index: {}]   ;;  %s4266_s11 = inlined_call_operand.vmem [shape: f32[2,1,128], index: 11, kind: input, shape index: {}]   ;;  %s4267_s12 = inlined_call_operand.vmem [shape: bf16[2,128,128], index: 12, kind: input, shape index: {}]   ;;  %s4268_s13 = inlined_call_operand.vmem [shape: f32[2,1,128], index: 13, kind: input, shape index: {}]   ;;  %s4269_s14 = inlined_call_operand.vmem [shape: f32[1,128], index: 14, kind: input, shape index: {}]   ;;  %s4270_s15 = inlined_call_operand.vmem [shape: f32[1,128], index: 15, kind: input, shape index: {}]   ;;  %s4271_s16 = inlined_call_operand.hbm [shape: f32[2,8,128], index: 16, kind: output, shape index: {}]  }
   0x1   :  { %4280 = sst [smem:[#allocation10_spill]] %s4255_s0 }
   0x2   :  { %4281 = sst [smem:[#allocation11_spill]] %s4256_s1 }
   0x3   :  { %21 = vsyncpa [#allocation3], 0 }
   0x4   :  { %23 = vsyncpa [#allocation3 + $0x1], 0  ;;  %s3606_s21 = smov 0   ;;  %s3608_s22 = smov 0  }
   0x5   :  { %s3610_s23 = smov 0   ;;  %s3612_s24 = smov 0  }
   0x6 LB: > { %4282 = sst [smem:[#allocation5_spill]] %s3503_s21  ;;  %s3627_s25 = sadd.s32 4294967295, %s3515_s24   ;;  %s3515_s24 = sphi %s3612_s24, %s4295_s24   ;;  %s3511_s23 = sphi %s3610_s23, %s4297_s23   ;;  %s3507_s22 = sphi %s3608_s22, %s4299_s22   ;;  %s3503_s21 = sphi %s3606_s21, %s4298_s21  }
   0x7   : > { %4283 = sst [smem:[#allocation6_spill]] %s3511_s23  ;;  %s2612_s26 = sadd.s32 4294967294, %s3515_s24  }
   0x8   : > { %s3631_s27 = sadd.s32 1, %s3515_s24   ;;  %s382_s28 = sadd.s32 1, %s3511_s23 }
   0x9   : > { %4284 = sst [smem:[#allocation7_spill]] %s3631_s27  ;;  %s379_s29 = ssub.s32 %s3515_s24, %s3631_s27 }
   0xa   : > { %p392_p0 = scmp.ne.s32.totalorder %s3511_s23, %s3507_s22  ;;  %p380_p1 = scmp.eq.s32.totalorder %s379_s29, 0 }
   0xb   : > { %p393_p2 = scmp.eq.s32.totalorder %s3627_s25, 1  ;;  %p398_p3 = scmp.ne.s32.totalorder %s3507_s22, %s3503_s21 }
   0xc   : > { %p399_p4 = scmp.eq.s32.totalorder %s2612_s26, 1  ;;  %p2615_p7 = scmp.ge.s32.totalorder %s3515_s24, 1 }
   0xd   : > { %s3642_s30 = scalar_select %p380_p1, %s3511_s23, %s382_s28  }
   0xe   : > { %p3644_p5 = por %p393_p2, %p392_p0  ;;  %p3648_p6 = por %p399_p4, %p398_p3 }
   0xf   : > { %4285 = sst [smem:[#allocation8_spill]] %s3642_s30  ;;  %p473_p8 = scmp.lt.s32.totalorder %s3515_s24, 3 }
  0x10   : > { %s4287_s17 = scalar_select %p3648_p6, 1, 0 }
  0x11   : > { %p474_p9 = pnand %p2615_p7, %p473_p8 }
  0x12   : > { %4288 = sst [smem:[#allocation9_spill]] %s4287_s17  ;;  %p526_p10 = scmp.lt.s32.totalorder (!%p474_p9), %s3627_s25, 1 }
  0x13   : > { %477 = sbr.rel (%p474_p9) target bundleno = 3895 (0xf37), region = 84  ;;  %s4289_s28 = sld [smem:[#allocation10_spill]] (!%p474_p9) }
  0x14   : > { %s3519_s23 = smov (!%p474_p9), 96   ;;  %s4291_s1 = sld [smem:[#allocation11_spill]] (!%p474_p9) }
  0x15   : > { %s523_s17 = sand.u32 (!%p474_p9), 1, %s3507_s22  }
  0x16   : > { %s2616_s20 = sshll.u32 (!%p474_p9), %s523_s17, 3 }
  0x18   : > { %s3656_s18 = scalar_select %p526_p10, %s3627_s25, 1  ;;  %v3517_v1 = vmov 128.0   ;;  %v3518_v12 = vmov 127.0   ;;  %v3225_v15 = vld [vmem:[%s4259_s4 + $0x38] sm:$0xff]  ;;  %v3224_v20 = vld [vmem:[%s4259_s4 + $0x30] sm:$0xff]  ;;  %v3223_v25 = vld [vmem:[%s4259_s4 + $0x28] sm:$0xff] }
  0x19   : > { %3397 = vrcp.f32 %v3517_v1  ;;  %v3233_v16 = vld [vmem:[%s4259_s4 + $0x78] sm:$0xff]  ;;  %726 = vmatpush.bf16.msra.mxu0 %v3225_v15  ;;  %v3232_v21 = vld [vmem:[%s4259_s4 + $0x70] sm:$0xff]  ;;  %v3231_v26 = vld [vmem:[%s4259_s4 + $0x68] sm:$0xff]  ;;  %vm931_vm8 = vcmask 261120   ;;  %vm1023_vm9 = vcmask 64512   ;;  %vm1077_vm10 = vcmask 1043456  }
  0x1a   : > { %s4272_s19 = sshll.u32 %s3656_s18, 3  ;;  %3399 = vrcp.f32 %v3518_v12  ;;  %v3241_v17 = vld [vmem:[%s4259_s4 + $0xb8] sm:$0xff]  ;;  %787 = vmatpush.bf16.msra.mxu1 %v3233_v16  ;;  %v3240_v22 = vld [vmem:[%s4259_s4 + $0xb0] sm:$0xff]  ;;  %v3239_v27 = vld [vmem:[%s4259_s4 + $0xa8] sm:$0xff]  ;;  %s4290_s27 = sshll.u32 %s3656_s18, 3 }
  0x1b   : > { %s529_s29 = scalar_lea.vmem %s4289_s28, %s4272_s19  ;;  %v3249_v18 = vld [vmem:[%s4259_s4 + $0xf8] sm:$0xff]  ;;  %848 = vmatpush.bf16.msra.mxu2 %v3241_v17  ;;  %v3248_v23 = vld [vmem:[%s4259_s4 + $0xf0] sm:$0xff]  ;;  %v3247_v28 = vld [vmem:[%s4259_s4 + $0xe8] sm:$0xff]  ;;  %s533_s26 = scalar_lea.vmem %s4291_s1, %s4290_s27 }
  0x1c   : > { %v3664_v0 = vld [vmem:[%s529_s29] sm:$0xff]  ;;  %909 = vmatpush.bf16.msra.mxu3 %v3249_v18  ;;  %v3221_v35 = vld [vmem:[%s4259_s4 + $0x18] sm:$0xff]  ;;  %v3220_v41 = vld [vmem:[%s4259_s4 + $0x10] sm:$0xff]  ;;  %s4278_s18 = smov 64   ;;  %s525_s27 = scalar_lea.vmem [#allocation2], %s2616_s20 }
  0x1d   : > { %539 = vadd.xlane.f32.xlu0 %v3664_v0  ;;  %727 = vmatpush.bf16.msra.mxu0 %v3224_v20  ;;  %v3222_v30 = vld [vmem:[%s4259_s4 + $0x20] sm:$0xff]  ;;  %v3229_v36 = vld [vmem:[%s4259_s4 + $0x58] sm:$0xff]  ;;  %v3228_v42 = vld [vmem:[%s4259_s4 + $0x50] sm:$0xff] }
  0x1e   : > { %788 = vmatpush.bf16.msra.mxu1 %v3232_v21  ;;  %v3230_v31 = vld [vmem:[%s4259_s4 + $0x60] sm:$0xff]  ;;  %v3237_v37 = vld [vmem:[%s4259_s4 + $0x98] sm:$0xff]  ;;  %v3236_v43 = vld [vmem:[%s4259_s4 + $0x90] sm:$0xff] }
  0x1f   : > { %v3398_v2 = vpop.eup %3397  ;;  %849 = vmatpush.bf16.msra.mxu2 %v3240_v22  ;;  %v3238_v32 = vld [vmem:[%s4259_s4 + $0xa0] sm:$0xff]  ;;  %v3245_v38 = vld [vmem:[%s4259_s4 + $0xd8] sm:$0xff]  ;;  %v3244_v44 = vld [vmem:[%s4259_s4 + $0xd0] sm:$0xff] }
  0x20   : > { %v542_v3 = vmul.f32 128.0, %v3398_v2  ;;  %vm546_vm0 = vweird.f32 %v3398_v2  ;;  %v3400_v13 = vpop.eup %3399  ;;  %910 = vmatpush.bf16.msra.mxu3 %v3248_v23  ;;  %v3246_v33 = vld [vmem:[%s4259_s4 + $0xe0] sm:$0xff]  ;;  %v3219_v45 = vld [vmem:[%s4259_s4 + $0x8] sm:$0xff] }
  0x21   : > { %v554_v14 = vmul.f32 127.0, %v3400_v13  ;;  %728 = vmatpush.bf16.msra.mxu0 %v3223_v25  ;;  %vm558_vm1 = vweird.f32 %v3400_v13  ;;  %v3227_v46 = vld [vmem:[%s4259_s4 + $0x48] sm:$0xff]  ;;  %v3218_v51 = vld [vmem:[%s4259_s4] sm:$0xff] }
  0x22   : > { %v543_v4 = vsub.f32 1.0, %v542_v3  ;;  %789 = vmatpush.bf16.msra.mxu1 %v3231_v26  ;;  %v3235_v47 = vld [vmem:[%s4259_s4 + $0x88] sm:$0xff]  ;;  %v3226_v52 = vld [vmem:[%s4259_s4 + $0x40] sm:$0xff] }
  0x23   : > { %v555_v19 = vsub.f32 1.0, %v554_v14  ;;  %850 = vmatpush.bf16.msra.mxu2 %v3239_v27  ;;  %v3243_v48 = vld [vmem:[%s4259_s4 + $0xc8] sm:$0xff]  ;;  %v3234_v53 = vld [vmem:[%s4259_s4 + $0x80] sm:$0xff] }
  0x24   : > { %v544_v5 = vmul.f32 %v3398_v2, %v543_v4  ;;  %911 = vmatpush.bf16.msra.mxu3 %v3247_v28  ;;  %v3242_v54 = vld [vmem:[%s4259_s4 + $0xc0] sm:$0xff] }
  0x25   : > { %v556_v24 = vmul.f32 %v3400_v13, %v555_v19  ;;  %729 = vmatpush.bf16.msra.mxu0 %v3222_v30  ;;  %v3374_v14 = vld [vmem:[%s4258_s3] ss:$0 sm:$0xff]  ;;  %v3377_v25 = vld [vmem:[%s4260_s5 + $0x2] ss:$0 sm:$0xff]  ;;  %v3378_v27 = vld [vmem:[%s4260_s5 + $0x3] ss:$0 sm:$0xff] }
  0x26   : > { %v545_v6 = vadd.f32 %v3398_v2, %v544_v5  ;;  %790 = vmatpush.bf16.msra.mxu1 %v3230_v31  ;;  %v3373_v5 = vld [vmem:[%s4257_s2] ss:$0 sm:$0xff] }
  0x27   : > { %v557_v29 = vadd.f32 %v3400_v13, %v556_v24  ;;  %851 = vmatpush.bf16.msra.mxu2 %v3238_v32  ;;  %v3375_v19 = vld [vmem:[%s4260_s5] ss:$0 sm:$0xff] }
  0x28   : > { %v3667_v7 = vsel %vm546_vm0, %v3398_v2, %v545_v6  ;;  %912 = vmatpush.bf16.msra.mxu3 %v3246_v33 }
  0x29   : > { %v3723_v34 = vsel %vm558_vm1, %v3400_v13, %v557_v29  ;;  %730 = vmatpush.bf16.msra.mxu0 %v3221_v35 }
  0x2a   : > { %791 = vmatpush.bf16.msra.mxu1 %v3229_v36 }
  0x2b   : > { %852 = vmatpush.bf16.msra.mxu2 %v3237_v37 }
  0x2c   : > { %913 = vmatpush.bf16.msra.mxu3 %v3245_v38 }
  0x2d   : > { %731 = vmatpush.bf16.msra.mxu0 %v3220_v41 }
  0x2e   : > { %792 = vmatpush.bf16.msra.mxu1 %v3228_v42 }
  0x2f   : > { %853 = vmatpush.bf16.msra.mxu2 %v3236_v43 }
  0x30   : > { %914 = vmatpush.bf16.msra.mxu3 %v3244_v44 }
  0x31   : > { %732 = vmatpush.bf16.msra.mxu0 %v3219_v45 }
  0x32   : > { %793 = vmatpush.bf16.msra.mxu1 %v3227_v46 }
  0x33   : > { %854 = vmatpush.bf16.msra.mxu2 %v3235_v47 }
  0x34   : > { %915 = vmatpush.bf16.msra.mxu3 %v3243_v48 }
  0x35   : > { %733 = vmatpush.bf16.msra.mxu0 %v3218_v51 }
  0x36   : > { %794 = vmatpush.bf16.msra.mxu1 %v3226_v52 }
  0x37   : > { %855 = vmatpush.bf16.msra.mxu2 %v3234_v53 }
  0x38   : > { %916 = vmatpush.bf16.msra.mxu3 %v3242_v54 }
  0x90   : > { %v540_v8 = vpop.xlane.xlu0 %539 }
  0x91   : > { %v548_v9 = vmul.f32 %v3667_v7, %v540_v8 }
  0x93   : > { %v3671_v10 = vsub.f32 %v3664_v0, %v548_v9 }
  0x95   : > { %v550_v11 = vmul.f32 %v3671_v10, %v3671_v10  ;;  %v564_v12 = vmul.f32 %v3373_v5, %v3671_v10  ;;  %v3376_v10 = vld [vmem:[%s4260_s5 + $0x1] ss:$0 sm:$0xff] }
  0x97   : > { %551 = vadd.xlane.f32.xlu0 %v550_v11 }
 0x10a   : > { %v552_v39 = vpop.xlane.xlu0 %551 }
 0x10b   : > { %v560_v40 = vmul.f32 %v3723_v34, %v552_v39 }
 0x10d   : > { %3401 = vrsqrt.f32 %v560_v40  ;;  %vm572_vm2 = vcmp.eq.f32.partialorder %v560_v40, inf  ;;  %v575_v60 = vand.u32 2147483648, %v560_v40  ;;  %vm574_vm3 = vcmp.eq.f32.partialorder %v560_v40, 0.0 }
 0x113   : > { %v3402_v49 = vpop.eup %3401 }
 0x114   : > { %v566_v50 = vmul.f32 %v3402_v49, %v560_v40 }
 0x116   : > { %v567_v55 = vmul.f32 %v3402_v49, %v566_v50 }
 0x118   : > { %v568_v56 = vmul.f32 0.5, %v567_v55  ;;  %v3819_v55 = vld [vmem:[%s533_s26] sm:$0xff]  ;;  %s3215_s26 = sshll.u32 %s3627_s25, 3  ;;  %s3473_s25 = scalar_lea.hbm %s4271_s16, 16 }
 0x11a   : > { %v569_v57 = vsub.f32 1.5, %v568_v56 }
 0x11c   : > { %v570_v58 = vmul.f32 %v3402_v49, %v569_v57 }
 0x11e   : > { %v571_v59 = vmul.f32 %v570_v58, %v560_v40 }
 0x120   : > { %v573_v61 = vsel %vm572_vm2, %v560_v40, %v571_v59 }
 0x121   : > { %v576_v62 = vsel %vm574_vm3, %v575_v60, %v573_v61 }
 0x122   : > { %v577_v63 = vadd.f32 1e-06, %v576_v62 }
 0x124   : > { %3403 = vrcp.f32 %v577_v63  ;;  %v589_v4 = vand.u32 2147483648, %v577_v63  ;;  %v587_v8 = vand.u32 2147483647, %v577_v63  ;;  %vm583_vm5 = vweird.f32 %v577_v63 }
 0x126   : > { %v590_v11 = vor.u32 1.1754944e-38, %v589_v4  ;;  %vm588_vm7 = vcmp.eq.f32.partialorder %v587_v8, 8.507059e+37 }
 0x12a   : > { %v3404_v1 = vpop.eup %3403 }
 0x12b   : > { %v579_v2 = vmul.f32 %v3404_v1, %v577_v63  ;;  %vm584_vm4 = vweird.f32 %v3404_v1 }
 0x12c   : > { %vm585_vm6 = vmor %vm583_vm5, %vm584_vm4 }
 0x12d   : > { %v580_v3 = vsub.f32 1.0, %v579_v2 }
 0x12f   : > { %v581_v6 = vmul.f32 %v3404_v1, %v580_v3 }
 0x131   : > { %v582_v9 = vadd.f32 %v3404_v1, %v581_v6 }
 0x133   : > { %v586_v13 = vsel %vm585_vm6, %v3404_v1, %v582_v9 }
 0x134   : > { %v591_v15 = vsel %vm588_vm7, %v590_v11, %v586_v13 }
 0x135   : > { %v592_v16 = vmul.f32 %v591_v15, %v564_v12 }
 0x137   : > { %v596_v17 = vadd.f32 %v3374_v14, %v592_v16 }
 0x139   : > { %v597_v18 = vpack.c.bf16 %v596_v17, %v596_v17 }
 0x13b   : > { %734 = vmatmul.bf16.vlgmr.msra.gmra.mxu0 %v597_v18  ;;  %795 = vmatmul.bf16.vlgmr.msra.gmra.mxu1 %v597_v18 }
 0x13c   : > { %856 = vmatmul.bf16.vlgmr.msra.gmra.mxu2 %v597_v18  ;;  %917 = vmatmul.bf16.vlgmr.msra.gmra.mxu3 %v597_v18 }
 0x1b8   : > { %v735_v20 = vpop.f32.mrf.mxu0  ;;  %v796_v21 = vpop.f32.mrf.mxu1 }
 0x1b9   : > { %v736_v22 = vadd.f32 %v3375_v19, %v735_v20  ;;  %v797_v24 = vadd.f32 %v3376_v10, %v796_v21 }
 0x1bb   : > { %v922_v23 = vpack.c.bf16 %v736_v22, %v736_v22  ;;  %v923_v28 = vpack.c.bf16 %v797_v24, %v797_v24 }
 0x1bd   : > { %v927_v26 = vunpack.c.l.b16 %v922_v23  ;;  %v952_v38 = vunpack.c.l.b16 %v923_v28 }
 0x1bf   : > { %v857_v29 = vpop.f32.mrf.mxu2  ;;  %v918_v30 = vpop.f32.mrf.mxu3  ;;  %v3793_v31 = vpack.c.b16 %v927_v26, %v927_v26  ;;  %v3797_v42 = vpack.c.b16 %v952_v38, %v952_v38  ;;  %v3255_v38 = vld [vmem:[%s4261_s6 + $0x28] sm:$0xff] }
 0x1c0   : > { %v858_v32 = vadd.f32 %v3377_v25, %v857_v29  ;;  %v737_v33 = vpop.f32.mrf.mxu0  ;;  %v798_v35 = vpop.f32.mrf.mxu1  ;;  %v919_v37 = vadd.f32 %v3378_v27, %v918_v30 }
 0x1c1   : > { %929 = vrot.lane.b32.xlu1 %v3793_v31, %s3519_s23 }
 0x1c2   : > { %v924_v36 = vpack.c.bf16 %v858_v32, %v858_v32  ;;  %v925_v40 = vpack.c.bf16 %v919_v37, %v919_v37 }
 0x1c4   : > { %v976_v39 = vunpack.c.l.b16 %v924_v36  ;;  %v1000_v45 = vunpack.c.l.b16 %v925_v40 }
 0x1c6   : > { %v977_v41 = vpack.c.b16 %v976_v39, %v976_v39  ;;  %v3802_v46 = vpack.c.b16 %v1000_v45, %v1000_v45 }
 0x1c7   : > { %v859_v43 = vpop.f32.mrf.mxu2  ;;  %v920_v44 = vpop.f32.mrf.mxu3 }
 0x1c8   : > { %978 = vrot.lane.b32.xlu2 %v977_v41, %s3519_s23 }
 0x1c9   : > { %954 = vrot.lane.b32.xlu1 %v3797_v42, %s3519_s23 }
 0x1d0   : > { %1002 = vrot.lane.b32.xlu2 %v3802_v46, %s3519_s23 }
 0x222   : > { %v979_v47 = vpop.permute.xlu2 %978 }
 0x223   : > { %v984_v50 = vsel %vm931_vm8, %v979_v47, 0 }
 0x22a   : > { %v1003_v51 = vpop.permute.xlu2 %1002 }
 0x22b   : > { %v1008_v54 = vsel %vm931_vm8, %v1003_v51, 0 }
 0x233   : > { %v930_v48 = vpop.permute.xlu1 %929 }
 0x234   : > { %v936_v49 = vsel %vm931_vm8, %v930_v48, 0 }
 0x235   : > { %945 = vmatpush.bf16.xpose.msrb.mxu2 %v936_v49 }
 0x23b   : > { %v955_v52 = vpop.permute.xlu1 %954 }
 0x23c   : > { %2747 = vmatmul.msk.bf16.vlgmr.msrb.gmra.mxu2 %vm931_vm8, %v922_v23  ;;  %v960_v53 = vsel %vm931_vm8, %v955_v52, 0 }
 0x23d   : > { %993 = vmatpush.bf16.xpose.msra.mxu2 %v984_v50  ;;  %969 = vmatpush.bf16.xpose.msrb.mxu3 %v960_v53 }
 0x244   : > { %2748 = vmatmul.msk.bf16.vlgmr.msrb.gmra.mxu3 %vm931_vm8, %v923_v28 }
 0x245   : > { %1017 = vmatpush.bf16.xpose.msra.mxu3 %v1008_v54 }
 0x24c   : > { %2749 = vmatmul.msk.bf16.vlgmr.msra.gmra.mxu2 %vm931_vm8, %v924_v36 }
 0x254   : > { %2750 = vmatmul.msk.bf16.vlgmr.msra.gmra.mxu3 %vm931_vm8, %v925_v40 }
 0x2bf   : > { %v947_v56 = vpop.f32.mrf.mxu2 }
 0x2c0   : > { %v948_v57 = vadd.f32 %v947_v56, %v3819_v55 }
 0x2c2   : > { %v1024_v58 = vsel %vm1023_vm9, %v948_v57, -inf }
 0x2c3   : > { %1025 = vmax.xlane.f32.xlu2 %v1024_v58  ;;  %v3257_v58 = vld [vmem:[%s4261_s6 + $0x38] sm:$0xff] }
 0x2c7   : > { %v949_v59 = vpop.f32.mrf.mxu2  ;;  %v971_v60 = vpop.f32.mrf.mxu3 }
 0x2c8   : > { %v972_v2 = vadd.f32 %v971_v60, %v3819_v55  ;;  %v3256_v59 = vld [vmem:[%s4261_s6 + $0x30] sm:$0xff]  ;;  %v3253_v60 = vld [vmem:[%s4261_s6 + $0x18] sm:$0xff] }
 0x2ca   : > { %v1027_v8 = vsel %vm1023_vm9, %v972_v2, -inf }
 0x2cf   : > { %v973_v61 = vpop.f32.mrf.mxu3  ;;  %v995_v62 = vpop.f32.mrf.mxu2 }
 0x2d0   : > { %v996_v63 = vadd.f32 %v995_v62, %v3819_v55  ;;  %v3252_v61 = vld [vmem:[%s4261_s6 + $0x10] sm:$0xff]  ;;  %v3251_v62 = vld [vmem:[%s4261_s6 + $0x8] sm:$0xff] }
 0x2d2   : > { %v1030_v1 = vsel %vm1023_vm9, %v996_v63, -inf }
 0x2d3   : > { %1031 = vmax.xlane.f32.xlu0 %v1030_v1 }
 0x2d7   : > { %v997_v3 = vpop.f32.mrf.mxu2  ;;  %v1019_v4 = vpop.f32.mrf.mxu3 }
 0x2d8   : > { %v1020_v5 = vadd.f32 %v1019_v4, %v3819_v55 }
 0x2da   : > { %v1033_v6 = vsel %vm1023_vm9, %v1020_v5, -inf }
 0x2db   : > { %1034 = vmax.xlane.f32.xlu1 %v1033_v6  ;;  %1028 = vmax.xlane.f32.xlu0 %v1027_v8 }
 0x2df   : > { %v1021_v9 = vpop.f32.mrf.mxu3 }
 0x2ef   : > { %1115 = vrot.lane.b32.xlu0 %v977_v41, %s4278_s18 }
 0x336   : > { %v1026_v11 = vpop.xlane.xlu2 %1025 }
 0x337   : > { %v1036_v12 = vsub.f32 %v948_v57, %v1026_v11  ;;  %v3254_v57 = vld [vmem:[%s4261_s6 + $0x20] sm:$0xff] }
 0x339   : > { %v1040_v13 = vmul.f32 1.442695, %v1036_v12 }
 0x33b   : > { %3405 = vpow2.f32 %v1040_v13 }
 0x341   : > { %v3406_v14 = vpop.eup %3405 }
 0x342   : > { %v1048_v15 = vsel %vm1023_vm9, %v3406_v14, 0.0 }
 0x343   : > { %1049 = vadd.xlane.f32.xlu2 %v1048_v15 }
 0x346   : > { %v1032_v16 = vpop.xlane.xlu0 %1031 }
 0x347   : > { %v1038_v17 = vsub.f32 %v996_v63, %v1032_v16  ;;  %v3250_v63 = vld [vmem:[%s4261_s6] sm:$0xff] }
 0x349   : > { %v1044_v18 = vmul.f32 1.442695, %v1038_v17 }
 0x34b   : > { %3407 = vpow2.f32 %v1044_v18 }
 0x34e   : > { %v1035_v19 = vpop.xlane.xlu1 %1034  ;;  %v1029_v10 = vpop.xlane.xlu0 %1028 }
 0x34f   : > { %v1039_v20 = vsub.f32 %v1020_v5, %v1035_v19  ;;  %v1037_v21 = vsub.f32 %v972_v2, %v1029_v10 }
 0x351   : > { %v3408_v22 = vpop.eup %3407  ;;  %v1046_v23 = vmul.f32 1.442695, %v1039_v20  ;;  %v1042_v24 = vmul.f32 1.442695, %v1037_v21 }
 0x352   : > { %v1054_v25 = vsel %vm1023_vm9, %v3408_v22, 0.0 }
 0x353   : > { %3409 = vpow2.f32 %v1046_v23  ;;  %1055 = vadd.xlane.f32.xlu0 %v1054_v25 }
 0x354   : > { %3411 = vpow2.f32 %v1042_v24  ;;  %v3379_v24 = vld [vmem:[%s4262_s7] ss:$0 sm:$0xff] }
 0x359   : > { %v3410_v26 = vpop.eup %3409 }
 0x35a   : > { %v3412_v27 = vpop.eup %3411  ;;  %v1057_v28 = vsel %vm1023_vm9, %v3410_v26, 0.0 }
 0x35b   : > { %1136 = vrot.lane.b32.xlu2 %v3802_v46, %s4278_s18  ;;  %1058 = vadd.xlane.f32.xlu0 %v1057_v28  ;;  %v1051_v29 = vsel %vm1023_vm9, %v3412_v27, 0.0 }
 0x35c   : > { %1052 = vadd.xlane.f32.xlu1 %v1051_v29 }
 0x361   : > { %v1116_v30 = vpop.permute.xlu0 %1115 }
 0x362   : > { %v1121_v32 = vsel %vm1077_vm10, %v1116_v30, 0 }
 0x363   : > { %1130 = vmatpush.bf16.msrb.mxu2 %v1121_v32 }
 0x367   : > { %1254 = vmatpush.bf16.msra.mxu2 %v3255_v38 }
 0x36b   : > { %1255 = vmatpush.bf16.msra.mxu2 %v3254_v57  ;;  %v3270_v57 = vld [vmem:[%s4267_s12 + $0x20] sm:$0xff] }
 0x36f   : > { %1094 = vrot.lane.b32.xlu0 %v3797_v42, %s4278_s18 }
 0x375   : > { %1072 = vrot.lane.b32.xlu1 %v3793_v31, %s4278_s18  ;;  %s2538_s18 = sshll.u32 %s525_s27, 4  ;;  %s2539_s18 = int_to_ptr.vmem [resolvable:$true] %s2538_s18 }
 0x3b6   : > { %v1050_v33 = vpop.xlane.xlu2 %1049 }
 0x3be   : > { %v1137_v35 = vpop.permute.xlu2 %1136 }
 0x3bf   : > { %v1142_v36 = vsel %vm1077_vm10, %v1137_v35, 0  ;;  %v3263_v35 = vld [vmem:[%s4265_s10 + $0x28] sm:$0xff] }
 0x3c0   : > { %1151 = vmatpush.bf16.msrb.mxu3 %v1142_v36  ;;  %v3262_v36 = vld [vmem:[%s4265_s10 + $0x20] sm:$0xff] }
 0x3c4   : > { %1282 = vmatpush.bf16.msra.mxu3 %v3257_v58  ;;  %v3269_v58 = vld [vmem:[%s4267_s12 + $0x18] sm:$0xff] }
 0x3c6   : > { %v1056_v37 = vpop.xlane.xlu0 %1055 }
 0x3c7   : > { %3413 = vrcp.f32 %v1056_v37  ;;  %v3261_v37 = vld [vmem:[%s4265_s10 + $0x18] sm:$0xff] }
 0x3c8   : > { %1283 = vmatpush.bf16.msra.mxu3 %v3256_v59 }
 0x3cd   : > { %v3414_v39 = vpop.eup %3413 }
 0x3ce   : > { %v1066_v40 = vmul.f32 %v3414_v39, %v3408_v22  ;;  %v1059_v41 = vpop.xlane.xlu0 %1058 }
 0x3cf   : > { %3415 = vrcp.f32 %v1059_v41  ;;  %v1053_v31 = vpop.xlane.xlu1 %1052  ;;  %v3259_v41 = vld [vmem:[%s4265_s10 + $0x8] sm:$0xff] }
 0x3d0   : > { %v1070_v42 = vpack.c.bf16 %v1066_v40, %v1066_v40  ;;  %3417 = vrcp.f32 %v1053_v31  ;;  %v3260_v40 = vld [vmem:[%s4265_s10 + $0x10] sm:$0xff] }
 0x3d1   : > { %3419 = vrcp.f32 %v1050_v33  ;;  %v3265_v33 = vld [vmem:[%s4265_s10 + $0x38] sm:$0xff] }
 0x3d2   : > { %2753 = vmatmul.msk.bf16.vlgmr.msrb.gmra.mxu2 %vm1023_vm9, %v1070_v42 }
 0x3d5   : > { %v3416_v43 = vpop.eup %3415 }
 0x3d6   : > { %v1067_v44 = vmul.f32 %v3416_v43, %v3410_v26  ;;  %v3418_v46 = vpop.eup %3417  ;;  %v3258_v43 = vld [vmem:[%s4265_s10] sm:$0xff] }
 0x3d7   : > { %v1065_v47 = vmul.f32 %v3418_v46, %v3412_v27  ;;  %v3420_v50 = vpop.eup %3419 }
 0x3d8   : > { %v1071_v45 = vpack.c.bf16 %v1067_v44, %v1067_v44  ;;  %v1064_v52 = vmul.f32 %v3420_v50, %v3406_v14 }
 0x3d9   : > { %v1069_v51 = vpack.c.bf16 %v1065_v47, %v1065_v47  ;;  %v3273_v47 = vld [vmem:[%s4267_s12 + $0x38] sm:$0xff] }
 0x3da   : > { %2754 = vmatmul.msk.bf16.vlgmr.msrb.gmra.mxu3 %vm1023_vm9, %v1071_v45  ;;  %v1068_v56 = vpack.c.bf16 %v1064_v52, %v1064_v52 }
 0x3e1   : > { %v1095_v48 = vpop.permute.xlu0 %1094 }
 0x3e2   : > { %v1100_v49 = vsel %vm1077_vm10, %v1095_v48, 0 }
 0x3e3   : > { %1109 = vmatpush.bf16.msrb.mxu1 %v1100_v49  ;;  %v3272_v49 = vld [vmem:[%s4267_s12 + $0x30] sm:$0xff] }
 0x3e6   : > { %2752 = vmatmul.msk.bf16.vlgmr.msrb.gmra.mxu1 %vm1023_vm9, %v1069_v51 }
 0x3e7   : > { %v1073_v53 = vpop.permute.xlu1 %1072  ;;  %1226 = vmatpush.bf16.msra.mxu1 %v3253_v60 }
 0x3e8   : > { %v1079_v54 = vsel %vm1077_vm10, %v1073_v53, 0 }
 0x3e9   : > { %1088 = vmatpush.bf16.msrb.mxu0 %v1079_v54  ;;  %v3271_v54 = vld [vmem:[%s4267_s12 + $0x28] sm:$0xff] }
 0x3eb   : > { %1227 = vmatpush.bf16.msra.mxu1 %v3252_v61 }
 0x3ec   : > { %2751 = vmatmul.msk.bf16.vlgmr.msrb.gmra.mxu0 %vm1023_vm9, %v1068_v56 }
 0x3ed   : > { %1198 = vmatpush.bf16.msra.mxu0 %v3251_v62  ;;  %v3268_v62 = vld [vmem:[%s4267_s12 + $0x10] sm:$0xff] }
 0x3ef   : > { %1496 = vmatpush.bf16.msrb.mxu1 %v3273_v47  ;;  %v3277_v47 = vld [vmem:[%s4259_s4 + $0x118] sm:$0xff] }
 0x3f1   : > { %1199 = vmatpush.bf16.msra.mxu0 %v3250_v63 }
 0x3f3   : > { %1497 = vmatpush.bf16.msrb.mxu1 %v3272_v49  ;;  %v3293_v49 = vld [vmem:[%s4259_s4 + $0x198] sm:$0xff] }
 0x3f5   : > { %1413 = vmatpush.bf16.msrb.mxu0 %v3265_v33  ;;  %v3281_v33 = vld [vmem:[%s4259_s4 + $0x138] sm:$0xff] }
 0x3f6   : > { %1689 = vmatpush.bf16.msrb.mxu2 %v3281_v33 }
 0x3f7   : > { %1498 = vmatpush.bf16.msrb.mxu1 %v3271_v54  ;;  %v3284_v54 = vld [vmem:[%s4259_s4 + $0x150] sm:$0xff] }
 0x3fb   : > { %1499 = vmatpush.bf16.msrb.mxu1 %v3270_v57  ;;  %v3300_v57 = vld [vmem:[%s4259_s4 + $0x1d0] sm:$0xff] }
 0x3ff   : > { %1500 = vmatpush.bf16.msrb.mxu1 %v3269_v58  ;;  %v3275_v58 = vld [vmem:[%s4259_s4 + $0x108] sm:$0xff] }
 0x403   : > { %1501 = vmatpush.bf16.msrb.mxu1 %v3268_v62 }
 0x455   : > { %v1132_v1 = vpop.f32.mrf.mxu2 }
 0x456   : > { %v1159_v2 = vpack.c.bf16 %v1132_v1, %v1132_v1  ;;  %v3380_v1 = vld [vmem:[%s4263_s8] ss:$0 sm:$0xff] }
 0x458   : > { %2781 = vmatmul.msk.bf16.vlgmr.msra.gmra.mxu2 %vm931_vm8, %v1159_v2 }
 0x45d   : > { %v1134_v3 = vpop.f32.mrf.mxu2  ;;  %v1153_v4 = vpop.f32.mrf.mxu3 }
 0x45e   : > { %v1160_v5 = vpack.c.bf16 %v1153_v4, %v1153_v4 }
 0x460   : > { %2790 = vmatmul.msk.bf16.vlgmr.msra.gmra.mxu3 %vm931_vm8, %v1160_v5 }
 0x463   : > { %v1111_v6 = vpop.f32.mrf.mxu1 }
 0x464   : > { %v1158_v8 = vpack.c.bf16 %v1111_v6, %v1111_v6 }
 0x465   : > { %v1155_v9 = vpop.f32.mrf.mxu3 }
 0x466   : > { %2772 = vmatmul.msk.bf16.vlgmr.msra.gmra.mxu1 %vm931_vm8, %v1158_v8  ;;  %v3381_v9 = vld [vmem:[%s4264_s9] ss:$0 sm:$0xff] }
 0x469   : > { %v1090_v11 = vpop.f32.mrf.mxu0 }
 0x46a   : > { %v1157_v12 = vpack.c.bf16 %v1090_v11, %v1090_v11 }
 0x46b   : > { %v1113_v13 = vpop.f32.mrf.mxu1 }
 0x46c   : > { %2763 = vmatmul.msk.bf16.vlgmr.msra.gmra.mxu0 %vm931_vm8, %v1157_v12 }
 0x471   : > { %v1092_v14 = vpop.f32.mrf.mxu0 }
 0x4db   : > { %v1257_v15 = vpop.f32.mrf.mxu2 }
 0x4e3   : > { %v1229_v16 = vpop.f32.mrf.mxu1  ;;  %v1259_v17 = vpop.f32.mrf.mxu2 }
 0x4e4   : > { %v1285_v18 = vpop.f32.mrf.mxu3  ;;  %v3382_v17 = vld [vmem:[%s4266_s11] ss:$0 sm:$0xff] }
 0x4e9   : > { %v1201_v19 = vpop.f32.mrf.mxu0 }
 0x4ea   : > { %v1289_v10 = vadd.f32 %v1229_v16, %v1201_v19  ;;  %v3266_v16 = vld [vmem:[%s4267_s12] sm:$0xff] }
 0x4eb   : > { %v1231_v20 = vpop.f32.mrf.mxu1 }
 0x4ec   : > { %v1290_v21 = vadd.f32 %v1289_v10, %v1257_v15  ;;  %v1287_v22 = vpop.f32.mrf.mxu3  ;;  %v3267_v15 = vld [vmem:[%s4267_s12 + $0x8] sm:$0xff] }
 0x4ed   : > { %1502 = vmatpush.bf16.msrb.mxu1 %v3267_v15  ;;  %v3383_v22 = vld [vmem:[%s4268_s13] ss:$0 sm:$0xff] }
 0x4ee   : > { %v1291_v23 = vadd.f32 %v1290_v21, %v1285_v18 }
 0x4f0   : > { %v1292_v25 = vadd.f32 %v1291_v23, %v3664_v0  ;;  %v3264_v0 = vld [vmem:[%s4265_s10 + $0x30] sm:$0xff] }
 0x4f1   : > { %v1203_v26 = vpop.f32.mrf.mxu0  ;;  %1414 = vmatpush.bf16.msrb.mxu0 %v3264_v0  ;;  %1503 = vmatpush.bf16.msrb.mxu1 %v3266_v16  ;;  %v3297_v0 = vld [vmem:[%s4259_s4 + $0x1b8] sm:$0xff] }
 0x4f2   : > { %v3880_v27 = vadd.f32 %v3379_v24, %v1292_v25 }
 0x4f4   : > { %1300 = vadd.xlane.f32.xlu0 %v3880_v27 }
 0x4f5   : > { %1415 = vmatpush.bf16.msrb.mxu0 %v3263_v35  ;;  %v3305_v35 = vld [vmem:[%s4259_s4 + $0x1f8] sm:$0xff] }
 0x4f6   : > { %1872 = vmatpush.bf16.msra.mxu1 %v3305_v35 }
 0x4f9   : > { %1416 = vmatpush.bf16.msrb.mxu0 %v3262_v36  ;;  %v3280_v36 = vld [vmem:[%s4259_s4 + $0x130] sm:$0xff] }
 0x4fa   : > { %1690 = vmatpush.bf16.msrb.mxu2 %v3280_v36 }
 0x4fd   : > { %1417 = vmatpush.bf16.msrb.mxu0 %v3261_v37  ;;  %v3288_v37 = vld [vmem:[%s4259_s4 + $0x170] sm:$0xff] }
 0x501   : > { %1418 = vmatpush.bf16.msrb.mxu0 %v3260_v40  ;;  %v3279_v40 = vld [vmem:[%s4259_s4 + $0x128] sm:$0xff] }
 0x502   : > { %1691 = vmatpush.bf16.msrb.mxu2 %v3279_v40  ;;  %v3387_v40 = vld [vmem:[%s4260_s5 + $0x7] ss:$0 sm:$0xff] }
 0x505   : > { %1419 = vmatpush.bf16.msrb.mxu0 %v3259_v41  ;;  %v3287_v41 = vld [vmem:[%s4259_s4 + $0x168] sm:$0xff] }
 0x509   : > { %1420 = vmatpush.bf16.msrb.mxu0 %v3258_v43  ;;  %v3278_v43 = vld [vmem:[%s4259_s4 + $0x120] sm:$0xff] }
 0x50a   : > { %1692 = vmatpush.bf16.msrb.mxu2 %v3278_v43 }
 0x50d   : > { %1811 = vmatpush.bf16.msra.mxu0 %v3297_v0  ;;  %v3386_v0 = vld [vmem:[%s4260_s5 + $0x6] ss:$0 sm:$0xff] }
 0x50e   : > { %1693 = vmatpush.bf16.msrb.mxu2 %v3277_v47 }
 0x567   : > { %v1301_v28 = vpop.xlane.xlu0 %1300 }
 0x568   : > { %v1302_v29 = vmul.f32 %v1301_v28, %v3667_v7 }
 0x56a   : > { %v1303_v30 = vsub.f32 %v3880_v27, %v1302_v29 }
 0x56c   : > { %v1304_v32 = vmul.f32 %v1303_v30, %v1303_v30  ;;  %v1311_v6 = vmul.f32 %v3380_v1, %v1303_v30  ;;  %v3274_v1 = vld [vmem:[%s4259_s4 + $0x100] sm:$0xff] }
 0x56e   : > { %1305 = vadd.xlane.f32.xlu2 %v1304_v32 }
 0x5e1   : > { %v1306_v38 = vpop.xlane.xlu2 %1305 }
 0x5e2   : > { %v1307_v39 = vmul.f32 %v1306_v38, %v3723_v34  ;;  %v3296_v38 = vld [vmem:[%s4259_s4 + $0x1b0] sm:$0xff] }
 0x5e3   : > { %1812 = vmatpush.bf16.msra.mxu0 %v3296_v38  ;;  %v3389_v38 = vld [vmem:[%s4260_s5 + $0x5] ss:$0 sm:$0xff] }
 0x5e4   : > { %3421 = vrsqrt.f32 %v1307_v39  ;;  %vm1319_vm11 = vcmp.eq.f32.partialorder %v1307_v39, inf  ;;  %v1322_v51 = vand.u32 2147483648, %v1307_v39  ;;  %vm1321_vm12 = vcmp.eq.f32.partialorder %v1307_v39, 0.0 }
 0x5ea   : > { %v3422_v42 = vpop.eup %3421 }
 0x5eb   : > { %v1313_v31 = vmul.f32 %v3422_v42, %v1307_v39 }
 0x5ed   : > { %v1314_v44 = vmul.f32 %v3422_v42, %v1313_v31  ;;  %v3303_v31 = vld [vmem:[%s4259_s4 + $0x1e8] sm:$0xff] }
 0x5ef   : > { %v1315_v45 = vmul.f32 0.5, %v1314_v44  ;;  %v3286_v44 = vld [vmem:[%s4259_s4 + $0x160] sm:$0xff] }
 0x5f1   : > { %v1316_v46 = vsub.f32 1.5, %v1315_v45  ;;  %v3294_v45 = vld [vmem:[%s4259_s4 + $0x1a0] sm:$0xff] }
 0x5f3   : > { %v1317_v48 = vmul.f32 %v3422_v42, %v1316_v46  ;;  %v3295_v42 = vld [vmem:[%s4259_s4 + $0x1a8] sm:$0xff]  ;;  %v3302_v46 = vld [vmem:[%s4259_s4 + $0x1e0] sm:$0xff] }
 0x5f4   : > { %1813 = vmatpush.bf16.msra.mxu0 %v3295_v42 }
 0x5f5   : > { %v1318_v50 = vmul.f32 %v1317_v48, %v1307_v39  ;;  %v3285_v48 = vld [vmem:[%s4259_s4 + $0x158] sm:$0xff] }
 0x5f7   : > { %v1320_v52 = vsel %vm1319_vm11, %v1307_v39, %v1318_v50  ;;  %v3304_v39 = vld [vmem:[%s4259_s4 + $0x1f0] sm:$0xff]  ;;  %v3301_v50 = vld [vmem:[%s4259_s4 + $0x1d8] sm:$0xff] }
 0x5f8   : > { %v1323_v53 = vsel %vm1321_vm12, %v1322_v51, %v1320_v52  ;;  %1873 = vmatpush.bf16.msra.mxu1 %v3304_v39  ;;  %1814 = vmatpush.bf16.msra.mxu0 %v3294_v45 }
 0x5f9   : > { %v1324_v56 = vadd.f32 1e-06, %v1323_v53  ;;  %v3276_v53 = vld [vmem:[%s4259_s4 + $0x110] sm:$0xff] }
 0x5fa   : > { %1694 = vmatpush.bf16.msrb.mxu2 %v3276_v53 }
 0x5fb   : > { %3423 = vrcp.f32 %v1324_v56  ;;  %v1336_v63 = vand.u32 2147483648, %v1324_v56  ;;  %v1334_v3 = vand.u32 2147483647, %v1324_v56  ;;  %vm1330_vm14 = vweird.f32 %v1324_v56 }
 0x5fc   : > { %1874 = vmatpush.bf16.msra.mxu1 %v3303_v31  ;;  %1815 = vmatpush.bf16.msra.mxu0 %v3293_v49 }
 0x5fd   : > { %v1337_v5 = vor.u32 1.1754944e-38, %v1336_v63  ;;  %vm1335_vm0 = vcmp.eq.f32.partialorder %v1334_v3, 8.507059e+37  ;;  %v3290_v3 = vld [vmem:[%s4259_s4 + $0x180] sm:$0xff] }
 0x5fe   : > { %1695 = vmatpush.bf16.msrb.mxu2 %v3275_v58 }
 0x600   : > { %1875 = vmatpush.bf16.msra.mxu1 %v3302_v46 }
 0x601   : > { %v3424_v59 = vpop.eup %3423 }
 0x602   : > { %v1326_v60 = vmul.f32 %v3424_v59, %v1324_v56  ;;  %vm1331_vm13 = vweird.f32 %v3424_v59  ;;  %v3292_v56 = vld [vmem:[%s4259_s4 + $0x190] sm:$0xff]  ;;  %1696 = vmatpush.bf16.msrb.mxu2 %v3274_v1 }
 0x603   : > { %vm1332_vm15 = vmor %vm1330_vm14, %vm1331_vm13  ;;  %1816 = vmatpush.bf16.msra.mxu0 %v3292_v56 }
 0x604   : > { %v1327_v61 = vsub.f32 1.0, %v1326_v60  ;;  %1876 = vmatpush.bf16.msra.mxu1 %v3301_v50  ;;  %v3291_v60 = vld [vmem:[%s4259_s4 + $0x188] sm:$0xff] }
 0x606   : > { %v1328_v2 = vmul.f32 %v3424_v59, %v1327_v61  ;;  %v3299_v61 = vld [vmem:[%s4259_s4 + $0x1c8] sm:$0xff] }
 0x607   : > { %1817 = vmatpush.bf16.msra.mxu0 %v3291_v60 }
 0x608   : > { %v1329_v4 = vadd.f32 %v3424_v59, %v1328_v2  ;;  %1877 = vmatpush.bf16.msra.mxu1 %v3300_v57  ;;  %v3282_v2 = vld [vmem:[%s4259_s4 + $0x140] sm:$0xff] }
 0x60a   : > { %v1333_v8 = vsel %vm1332_vm15, %v3424_v59, %v1329_v4  ;;  %v3283_v59 = vld [vmem:[%s4259_s4 + $0x148] sm:$0xff]  ;;  %v3298_v4 = vld [vmem:[%s4259_s4 + $0x1c0] sm:$0xff] }
 0x60b   : > { %v1338_v11 = vsel %vm1335_vm0, %v1337_v5, %v1333_v8  ;;  %1818 = vmatpush.bf16.msra.mxu0 %v3290_v3 }
 0x60c   : > { %v1339_v12 = vmul.f32 %v1338_v11, %v1311_v6  ;;  %1878 = vmatpush.bf16.msra.mxu1 %v3299_v61 }
 0x60e   : > { %v1343_v13 = vadd.f32 %v3381_v9, %v1339_v12 }
 0x610   : > { %v1344_v14 = vpack.c.bf16 %v1343_v13, %v1343_v13  ;;  %1879 = vmatpush.bf16.msra.mxu1 %v3298_v4 }
 0x612   : > { %1421 = vmatmul.bf16.vlgmr.msrb.gmra.mxu0 %v1344_v14 }
 0x68f   : > { %v1422_v18 = vpop.f32.mrf.mxu0 }
 0x690   : > { %v1423_v19 = vadd.f32 %v3382_v17, %v1422_v18 }
 0x692   : > { %v1426_v10 = vmax.f32 %v1423_v19, 0.0 }
 0x694   : > { %v1427_v20 = vpack.c.bf16 %v1426_v10, %v1426_v10  ;;  %v3384_v10 = vld [vmem:[%s4257_s2 + $0x1] ss:$0 sm:$0xff] }
 0x696   : > { %1504 = vmatmul.bf16.vlgmr.msrb.gmra.mxu1 %v1427_v20 }
 0x697   : > { %v1424_v21 = vpop.f32.mrf.mxu0 }
 0x713   : > { %v1505_v23 = vpop.f32.mrf.mxu1 }
 0x714   : > { %v1506_v24 = vadd.f32 %v3383_v22, %v1505_v23 }
 0x716   : > { %v3947_v25 = vadd.f32 %v1506_v24, %v3880_v27  ;;  %v3289_v27 = vld [vmem:[%s4259_s4 + $0x178] sm:$0xff] }
 0x717   : > { %1750 = vmatpush.bf16.msrb.mxu3 %v3289_v27 }
 0x718   : > { %1514 = vadd.xlane.f32.xlu1 %v3947_v25 }
 0x71b   : > { %v1507_v26 = vpop.f32.mrf.mxu1  ;;  %1751 = vmatpush.bf16.msrb.mxu3 %v3288_v37  ;;  %v3388_v37 = vld [vmem:[%s4260_s5 + $0x4] ss:$0 sm:$0xff] }
 0x71f   : > { %1752 = vmatpush.bf16.msrb.mxu3 %v3287_v41 }
 0x723   : > { %1753 = vmatpush.bf16.msrb.mxu3 %v3286_v44 }
 0x727   : > { %1754 = vmatpush.bf16.msrb.mxu3 %v3285_v48 }
 0x72b   : > { %1755 = vmatpush.bf16.msrb.mxu3 %v3284_v54 }
 0x72f   : > { %1756 = vmatpush.bf16.msrb.mxu3 %v3283_v59 }
 0x733   : > { %1757 = vmatpush.bf16.msrb.mxu3 %v3282_v2 }
 0x78b   : > { %v1515_v28 = vpop.xlane.xlu1 %1514 }
 0x78c   : > { %v1516_v29 = vmul.f32 %v1515_v28, %v3667_v7  ;;  %v3385_v28 = vld [vmem:[%s4258_s3 + $0x1] ss:$0 sm:$0xff] }
 0x78e   : > { %v3952_v30 = vsub.f32 %v3947_v25, %v1516_v29 }
 0x790   : > { %v1518_v32 = vmul.f32 %v3952_v30, %v3952_v30  ;;  %v1525_v24 = vmul.f32 %v3384_v10, %v3952_v30 }
 0x792   : > { %1519 = vadd.xlane.f32.xlu0 %v1518_v32 }
 0x805   : > { %v1520_v51 = vpop.xlane.xlu0 %1519 }
 0x806   : > { %v1521_v52 = vmul.f32 %v1520_v51, %v3723_v34 }
 0x808   : > { %3425 = vrsqrt.f32 %v1521_v52  ;;  %vm1533_vm1 = vcmp.eq.f32.partialorder %v1521_v52, inf  ;;  %v1536_v12 = vand.u32 2147483648, %v1521_v52  ;;  %vm1535_vm2 = vcmp.eq.f32.partialorder %v1521_v52, 0.0 }
 0x80e   : > { %v3426_v62 = vpop.eup %3425 }
 0x80f   : > { %v1527_v63 = vmul.f32 %v3426_v62, %v1521_v52 }
 0x811   : > { %v1528_v5 = vmul.f32 %v3426_v62, %v1527_v63 }
 0x813   : > { %v1529_v6 = vmul.f32 0.5, %v1528_v5 }
 0x815   : > { %v1530_v8 = vsub.f32 1.5, %v1529_v6 }
 0x817   : > { %v1531_v9 = vmul.f32 %v3426_v62, %v1530_v8 }
 0x819   : > { %v1532_v11 = vmul.f32 %v1531_v9, %v1521_v52 }
 0x81b   : > { %v1534_v13 = vsel %vm1533_vm1, %v1521_v52, %v1532_v11 }
 0x81c   : > { %v1537_v14 = vsel %vm1535_vm2, %v1536_v12, %v1534_v13 }
 0x81d   : > { %v1538_v15 = vadd.f32 1e-06, %v1537_v14 }
 0x81f   : > { %3427 = vrcp.f32 %v1538_v15  ;;  %v1550_v19 = vand.u32 2147483648, %v1538_v15  ;;  %v1548_v21 = vand.u32 2147483647, %v1538_v15  ;;  %vm1544_vm4 = vweird.f32 %v1538_v15 }
 0x821   : > { %v1551_v23 = vor.u32 1.1754944e-38, %v1550_v19  ;;  %vm1549_vm6 = vcmp.eq.f32.partialorder %v1548_v21, 8.507059e+37 }
 0x825   : > { %v3428_v16 = vpop.eup %3427 }
 0x826   : > { %v1540_v17 = vmul.f32 %v3428_v16, %v1538_v15  ;;  %vm1545_vm3 = vweird.f32 %v3428_v16 }
 0x827   : > { %vm1546_vm5 = vmor %vm1544_vm4, %vm1545_vm3 }
 0x828   : > { %v1541_v18 = vsub.f32 1.0, %v1540_v17 }
 0x82a   : > { %v1542_v20 = vmul.f32 %v3428_v16, %v1541_v18 }
 0x82c   : > { %v1543_v22 = vadd.f32 %v3428_v16, %v1542_v20 }
 0x82e   : > { %v1547_v26 = vsel %vm1546_vm5, %v3428_v16, %v1543_v22 }
 0x82f   : > { %v1552_v29 = vsel %vm1549_vm6, %v1551_v23, %v1547_v26 }
 0x830   : > { %v1553_v32 = vmul.f32 %v1552_v29, %v1525_v24 }
 0x832   : > { %v1557_v33 = vadd.f32 %v3385_v28, %v1553_v32 }
 0x834   : > { %v1558_v27 = vpack.c.bf16 %v1557_v33, %v1557_v33 }
 0x836   : > { %1697 = vmatmul.bf16.vlgmr.msrb.gmra.mxu2 %v1558_v27  ;;  %1758 = vmatmul.bf16.vlgmr.msrb.gmra.mxu3 %v1558_v27 }
 0x837   : > { %1819 = vmatmul.bf16.vlgmr.msra.gmra.mxu0 %v1558_v27  ;;  %1880 = vmatmul.bf16.vlgmr.msra.gmra.mxu1 %v1558_v27 }
 0x8b4   : > { %v1820_v35 = vpop.f32.mrf.mxu0  ;;  %v1881_v30 = vpop.f32.mrf.mxu1 }
 0x8b5   : > { %v1821_v36 = vadd.f32 %v3386_v0, %v1820_v35  ;;  %v1882_v46 = vadd.f32 %v3387_v40, %v1881_v30 }
 0x8b7   : > { %v1887_v39 = vpack.c.bf16 %v1821_v36, %v1821_v36  ;;  %v1888_v53 = vpack.c.bf16 %v1882_v46, %v1882_v46 }
 0x8b9   : > { %v1938_v41 = vunpack.c.l.b16 %v1887_v39  ;;  %v1698_v42 = vpop.f32.mrf.mxu2  ;;  %v1759_v31 = vpop.f32.mrf.mxu3  ;;  %v1962_v59 = vunpack.c.l.b16 %v1888_v53 }
 0x8ba   : > { %v1699_v43 = vadd.f32 %v3388_v37, %v1698_v42  ;;  %v1760_v44 = vadd.f32 %v3389_v38, %v1759_v31 }
 0x8bb   : > { %v1939_v45 = vpack.c.b16 %v1938_v41, %v1938_v41  ;;  %v4078_v60 = vpack.c.b16 %v1962_v59, %v1962_v59 }
 0x8bc   : > { %v1885_v47 = vpack.c.bf16 %v1699_v43, %v1699_v43  ;;  %v1886_v48 = vpack.c.bf16 %v1760_v44, %v1760_v44  ;;  %v1822_v49 = vpop.f32.mrf.mxu0  ;;  %v1883_v50 = vpop.f32.mrf.mxu1 }
 0x8bd   : > { %1940 = vrot.lane.b32.xlu1 %v1939_v45, %s3519_s23  ;;  %v3309_v50 = vld [vmem:[%s4261_s6 + $0x58] sm:$0xff] }
 0x8be   : > { %v1890_v51 = vunpack.c.l.b16 %v1885_v47  ;;  %v1914_v52 = vunpack.c.l.b16 %v1886_v48 }
 0x8c0   : > { %v4073_v54 = vpack.c.b16 %v1890_v51, %v1890_v51  ;;  %v1915_v56 = vpack.c.b16 %v1914_v52, %v1914_v52 }
 0x8c1   : > { %v1700_v57 = vpop.f32.mrf.mxu2  ;;  %v1761_v58 = vpop.f32.mrf.mxu3 }
 0x8c2   : > { %1916 = vrot.lane.b32.xlu2 %v1915_v56, %s3519_s23  ;;  %1892 = vrot.lane.b32.xlu0 %v4073_v54, %s3519_s23 }
 0x8ca   : > { %1964 = vrot.lane.b32.xlu0 %v4078_v60, %s3519_s23  ;;  %s4292_s23 = smov 64  }
 0x91c   : > { %v1917_v61 = vpop.permute.xlu2 %1916 }
 0x91d   : > { %v1922_v62 = vsel %vm931_vm8, %v1917_v61, 0 }
 0x91e   : > { %1931 = vmatpush.bf16.xpose.msra.mxu3 %v1922_v62 }
 0x925   : > { %3054 = vmatmul.msk.bf16.vlgmr.msra.gmra.mxu3 %vm931_vm8, %v1886_v48 }
 0x92f   : > { %v1941_v63 = vpop.permute.xlu1 %1940 }
 0x930   : > { %v1946_v3 = vsel %vm931_vm8, %v1941_v63, 0 }
 0x934   : > { %v1893_v1 = vpop.permute.xlu0 %1892 }
 0x935   : > { %v1898_v2 = vsel %vm931_vm8, %v1893_v1, 0 }
 0x936   : > { %1907 = vmatpush.bf16.xpose.msra.mxu2 %v1898_v2 }
 0x93c   : > { %v1965_v4 = vpop.permute.xlu0 %1964 }
 0x93d   : > { %v1970_v5 = vsel %vm931_vm8, %v1965_v4, 0  ;;  %3053 = vmatmul.msk.bf16.vlgmr.msra.gmra.mxu2 %vm931_vm8, %v1885_v47 }
 0x93e   : > { %1955 = vmatpush.bf16.xpose.msrb.mxu2 %v1946_v3  ;;  %1979 = vmatpush.bf16.xpose.msrb.mxu3 %v1970_v5 }
 0x945   : > { %3056 = vmatmul.msk.bf16.vlgmr.msrb.gmra.mxu3 %vm931_vm8, %v1888_v53 }
 0x94d   : > { %3055 = vmatmul.msk.bf16.vlgmr.msrb.gmra.mxu2 %vm931_vm8, %v1887_v39 }
 0x9a8   : > { %v1933_v6 = vpop.f32.mrf.mxu3 }
 0x9a9   : > { %v1934_v17 = vadd.f32 %v1933_v6, %v3819_v55  ;;  %v3308_v6 = vld [vmem:[%s4261_s6 + $0x50] sm:$0xff] }
 0x9ab   : > { %v1988_v21 = vsel %vm1023_vm9, %v1934_v17, -inf }
 0x9b0   : > { %v1935_v8 = vpop.f32.mrf.mxu3 }
 0x9b1   : > { %v3311_v8 = vld [vmem:[%s4261_s6 + $0x68] sm:$0xff] }
 0x9c0   : > { %v1909_v9 = vpop.f32.mrf.mxu2 }
 0x9c1   : > { %v1910_v11 = vadd.f32 %v1909_v9, %v3819_v55  ;;  %v3310_v9 = vld [vmem:[%s4261_s6 + $0x60] sm:$0xff] }
 0x9c3   : > { %v1985_v12 = vsel %vm1023_vm9, %v1910_v11, -inf }
 0x9c4   : > { %1986 = vmax.xlane.f32.xlu1 %v1985_v12  ;;  %v3312_v12 = vld [vmem:[%s4261_s6 + $0x70] sm:$0xff] }
 0x9c8   : > { %v1911_v13 = vpop.f32.mrf.mxu2  ;;  %v1981_v14 = vpop.f32.mrf.mxu3 }
 0x9c9   : > { %v1982_v15 = vadd.f32 %v1981_v14, %v3819_v55  ;;  %v3307_v13 = vld [vmem:[%s4261_s6 + $0x48] sm:$0xff]  ;;  %v3306_v14 = vld [vmem:[%s4261_s6 + $0x40] sm:$0xff] }
 0x9cb   : > { %v1994_v16 = vsel %vm1023_vm9, %v1982_v15, -inf }
 0x9cc   : > { %1995 = vmax.xlane.f32.xlu2 %v1994_v16 }
 0x9d0   : > { %v1957_v18 = vpop.f32.mrf.mxu2  ;;  %v1983_v19 = vpop.f32.mrf.mxu3 }
 0x9d1   : > { %v1958_v10 = vadd.f32 %v1957_v18, %v3819_v55 }
 0x9d3   : > { %v1991_v20 = vsel %vm1023_vm9, %v1958_v10, -inf }
 0x9d4   : > { %1992 = vmax.xlane.f32.xlu0 %v1991_v20  ;;  %1989 = vmax.xlane.f32.xlu2 %v1988_v21 }
 0x9d8   : > { %v1959_v22 = vpop.f32.mrf.mxu2 }
 0x9ec   : > { %2075 = vrot.lane.b32.xlu2 %v1939_v45, %s4292_s23 }
 0x9f4   : > { %2054 = vrot.lane.b32.xlu2 %v1915_v56, %s4292_s23 }
 0xa37   : > { %v1987_v23 = vpop.xlane.xlu1 %1986 }
 0xa38   : > { %v1997_v24 = vsub.f32 %v1910_v11, %v1987_v23  ;;  %v3313_v11 = vld [vmem:[%s4261_s6 + $0x78] sm:$0xff] }
 0xa3a   : > { %v2001_v26 = vmul.f32 1.442695, %v1997_v24 }
 0xa3c   : > { %3429 = vpow2.f32 %v2001_v26 }
 0xa3f   : > { %v1996_v28 = vpop.xlane.xlu2 %1995 }
 0xa40   : > { %v2000_v35 = vsub.f32 %v1982_v15, %v1996_v28 }
 0xa42   : > { %v3430_v29 = vpop.eup %3429  ;;  %v2007_v37 = vmul.f32 1.442695, %v2000_v35 }
 0xa43   : > { %v2009_v32 = vsel %vm1023_vm9, %v3430_v29, 0.0 }
 0xa44   : > { %2010 = vadd.xlane.f32.xlu0 %v2009_v32 }
 0xa47   : > { %v1990_v55 = vpop.xlane.xlu2 %1989  ;;  %v1993_v33 = vpop.xlane.xlu0 %1992 }
 0xa48   : > { %v1998_v27 = vsub.f32 %v1934_v17, %v1990_v55  ;;  %v1999_v0 = vsub.f32 %v1958_v10, %v1993_v33 }
 0xa4a   : > { %v2003_v30 = vmul.f32 1.442695, %v1998_v27  ;;  %v2005_v36 = vmul.f32 1.442695, %v1999_v0 }
 0xa4c   : > { %3431 = vpow2.f32 %v2003_v30 }
 0xa4d   : > { %3433 = vpow2.f32 %v2005_v36  ;;  %v3390_v36 = vld [vmem:[%s4262_s7 + $0x1] ss:$0 sm:$0xff] }
 0xa4e   : > { %3435 = vpow2.f32 %v2007_v37 }
 0xa4f   : > { %v2076_v38 = vpop.permute.xlu2 %2075 }
 0xa50   : > { %v2081_v39 = vsel %vm1077_vm10, %v2076_v38, 0 }
 0xa51   : > { %2090 = vmatpush.bf16.msra.mxu2 %v2081_v39 }
 0xa52   : > { %v3432_v40 = vpop.eup %3431 }
 0xa53   : > { %v3434_v41 = vpop.eup %3433  ;;  %v2012_v42 = vsel %vm1023_vm9, %v3432_v40, 0.0 }
 0xa54   : > { %2013 = vadd.xlane.f32.xlu1 %v2012_v42  ;;  %v2015_v31 = vsel %vm1023_vm9, %v3434_v41, 0.0  ;;  %v3436_v44 = vpop.eup %3435 }
 0xa55   : > { %2016 = vadd.xlane.f32.xlu0 %v2015_v31  ;;  %v2018_v46 = vsel %vm1023_vm9, %v3436_v44, 0.0  ;;  %2215 = vmatpush.bf16.msrb.mxu2 %v3311_v8 }
 0xa57   : > { %v2055_v43 = vpop.permute.xlu2 %2054 }
 0xa58   : > { %v2060_v45 = vsel %vm1077_vm10, %v2055_v43, 0 }
 0xa59   : > { %2069 = vmatpush.bf16.msrb.mxu1 %v2060_v45  ;;  %2216 = vmatpush.bf16.msrb.mxu2 %v3310_v9  ;;  %v3319_v45 = vld [vmem:[%s4265_s10 + $0x68] sm:$0xff] }
 0xa5c   : > { %2019 = vadd.xlane.f32.xlu1 %v2018_v46  ;;  %v3318_v46 = vld [vmem:[%s4265_s10 + $0x60] sm:$0xff] }
 0xa5d   : > { %2187 = vmatpush.bf16.msra.mxu1 %v3309_v50  ;;  %v3316_v50 = vld [vmem:[%s4265_s10 + $0x50] sm:$0xff] }
 0xa61   : > { %2188 = vmatpush.bf16.msra.mxu1 %v3308_v6  ;;  %v3325_v6 = vld [vmem:[%s4267_s12 + $0x58] sm:$0xff] }
 0xa69   : > { %2096 = vrot.lane.b32.xlu0 %v4078_v60, %s4292_s23 }
 0xa75   : > { %2033 = vrot.lane.b32.xlu1 %v4073_v54, %s4292_s23  ;;  %s2536_s23 = scalar_lea.hbm %s4271_s16, %s3215_s26  ;;  %s2526_s26 = scalar_lea.sflag [#allocation3], %s523_s17 }
 0xa76   : > { %s2540_s28 = sshll.u32 %s2536_s23, 4  ;;  %s2541_s28 = int_to_ptr.hbm [resolvable:$true] %s2540_s28 }
 0xa77   : > { %s3467_s29 = sshra.s32 %s2541_s28, 4  ;;  %s3468_s29 = int_to_ptr.hbm [resolvable:$true] %s3467_s29 }
 0xa78   : > { %s3469_s30 = scalar_lea.hbm %s3468_s29, 8  ;;  %p3474_p0 = scmp.lt.s32.totalorder %s3468_s29, %s4271_s16 }
 0xa79   : > { %p3470_p11 = scmp.ne.s32.totalorder %s3468_s29, %s3469_s30  ;;  %p3475_p1 = scmp.lt.s32.totalorder %s3473_s25, %s3469_s30 }
 0xa7b   : > { %p3471_p12 = pnand %p3470_p11, %p3644_p5  ;;  %p3476_p2 = por %p3475_p1, %p3474_p0 }
 0xa7d   : > { %p3472_p13 = pneg %p3471_p12 }
 0xa7f   : > { %p3477_p3 = pnand %p3476_p2, %p3472_p13 }
 0xab7   : > { %v2011_v47 = vpop.xlane.xlu0 %2010 }
 0xac7   : > { %v2014_v48 = vpop.xlane.xlu1 %2013 }
 0xac8   : > { %3437 = vrcp.f32 %v2014_v48  ;;  %v2017_v49 = vpop.xlane.xlu0 %2016 }
 0xac9   : > { %3439 = vrcp.f32 %v2017_v49 }
 0xace   : > { %v3438_v51 = vpop.eup %3437 }
 0xacf   : > { %v3440_v52 = vpop.eup %3439  ;;  %v2026_v53 = vmul.f32 %v3438_v51, %v3432_v40  ;;  %v2020_v56 = vpop.xlane.xlu1 %2019  ;;  %v3315_v51 = vld [vmem:[%s4265_s10 + $0x48] sm:$0xff] }
 0xad0   : > { %v2027_v57 = vmul.f32 %v3440_v52, %v3434_v41  ;;  %3441 = vrcp.f32 %v2020_v56  ;;  %v3314_v56 = vld [vmem:[%s4265_s10 + $0x40] sm:$0xff] }
 0xad1   : > { %v2030_v58 = vpack.c.bf16 %v2026_v53, %v2026_v53  ;;  %3443 = vrcp.f32 %v2011_v47  ;;  %v3317_v47 = vld [vmem:[%s4265_s10 + $0x58] sm:$0xff] }
 0xad2   : > { %v2031_v59 = vpack.c.bf16 %v2027_v57, %v2027_v57 }
 0xad3   : > { %3058 = vmatmul.msk.bf16.vlgmr.msrb.gmra.mxu1 %vm1023_vm9, %v2030_v58 }
 0xad4   : > { %3059 = vmatmul.msk.bf16.vlgmr.msra.gmra.mxu2 %vm1023_vm9, %v2031_v59 }
 0xad6   : > { %v3442_v54 = vpop.eup %3441 }
 0xad7   : > { %v2028_v60 = vmul.f32 %v3442_v54, %v3436_v44  ;;  %v3444_v1 = vpop.eup %3443  ;;  %v3321_v44 = vld [vmem:[%s4265_s10 + $0x78] sm:$0xff] }
 0xad8   : > { %v2025_v2 = vmul.f32 %v3444_v1, %v3430_v29  ;;  %v3329_v54 = vld [vmem:[%s4267_s12 + $0x78] sm:$0xff] }
 0xad9   : > { %v2032_v63 = vpack.c.bf16 %v2028_v60, %v2028_v60  ;;  %2464 = vmatpush.bf16.msrb.mxu1 %v3329_v54 }
 0xada   : > { %v2029_v5 = vpack.c.bf16 %v2025_v2, %v2025_v2 }
 0xadb   : > { %v2097_v61 = vpop.permute.xlu0 %2096 }
 0xadc   : > { %v2102_v62 = vsel %vm1077_vm10, %v2097_v61, 0  ;;  %v3328_v61 = vld [vmem:[%s4267_s12 + $0x70] sm:$0xff] }
 0xadd   : > { %2111 = vmatpush.bf16.msra.mxu3 %v2102_v62  ;;  %2465 = vmatpush.bf16.msrb.mxu1 %v3328_v61 }
 0xae0   : > { %3060 = vmatmul.msk.bf16.vlgmr.msra.gmra.mxu3 %vm1023_vm9, %v2032_v63 }
 0xae1   : > { %2243 = vmatpush.bf16.msrb.mxu3 %v3313_v11 }
 0xae5   : > { %2244 = vmatpush.bf16.msrb.mxu3 %v3312_v12  ;;  %v3324_v12 = vld [vmem:[%s4267_s12 + $0x50] sm:$0xff] }
 0xae7   : > { %v2034_v3 = vpop.permute.xlu1 %2033 }
 0xae8   : > { %v2039_v4 = vsel %vm1077_vm10, %v2034_v3, 0  ;;  %v3327_v3 = vld [vmem:[%s4267_s12 + $0x68] sm:$0xff] }
 0xae9   : > { %2048 = vmatpush.bf16.msrb.mxu0 %v2039_v4  ;;  %2466 = vmatpush.bf16.msrb.mxu1 %v3327_v3 }
 0xaec   : > { %3057 = vmatmul.msk.bf16.vlgmr.msrb.gmra.mxu0 %vm1023_vm9, %v2029_v5  ;;  %v3326_v5 = vld [vmem:[%s4267_s12 + $0x60] sm:$0xff] }
 0xaed   : > { %2159 = vmatpush.bf16.msra.mxu0 %v3307_v13  ;;  %2467 = vmatpush.bf16.msrb.mxu1 %v3326_v5 }
 0xaf1   : > { %2160 = vmatpush.bf16.msra.mxu0 %v3306_v14  ;;  %2468 = vmatpush.bf16.msrb.mxu1 %v3325_v6  ;;  %v3391_v14 = vld [vmem:[%s4263_s8 + $0x1] ss:$0 sm:$0xff] }
 0xaf5   : > { %2379 = vmatpush.bf16.msrb.mxu0 %v3321_v44  ;;  %2469 = vmatpush.bf16.msrb.mxu1 %v3324_v12 }
 0xb50   : > { %v2071_v15 = vpop.f32.mrf.mxu1 }
 0xb51   : > { %v2118_v16 = vpack.c.bf16 %v2071_v15, %v2071_v15 }
 0xb53   : > { %3094 = vmatmul.msk.bf16.vlgmr.msra.gmra.mxu1 %vm931_vm8, %v2118_v16 }
 0xb57   : > { %v2092_v17 = vpop.f32.mrf.mxu2 }
 0xb58   : > { %v2119_v18 = vpack.c.bf16 %v2092_v17, %v2092_v17  ;;  %v2073_v19 = vpop.f32.mrf.mxu1 }
 0xb5a   : > { %3103 = vmatmul.msk.bf16.vlgmr.msrb.gmra.mxu2 %vm931_vm8, %v2119_v18 }
 0xb5f   : > { %v2094_v10 = vpop.f32.mrf.mxu2 }
 0xb63   : > { %v2113_v20 = vpop.f32.mrf.mxu3 }
 0xb64   : > { %v2120_v21 = vpack.c.bf16 %v2113_v20, %v2113_v20  ;;  %v3392_v20 = vld [vmem:[%s4264_s9 + $0x1] ss:$0 sm:$0xff] }
 0xb66   : > { %3112 = vmatmul.msk.bf16.vlgmr.msrb.gmra.mxu3 %vm931_vm8, %v2120_v21 }
 0xb69   : > { %v2050_v22 = vpop.f32.mrf.mxu0 }
 0xb6a   : > { %v2117_v23 = vpack.c.bf16 %v2050_v22, %v2050_v22 }
 0xb6b   : > { %v2115_v24 = vpop.f32.mrf.mxu3 }
 0xb6c   : > { %3085 = vmatmul.msk.bf16.vlgmr.msra.gmra.mxu0 %vm931_vm8, %v2117_v23 }
 0xb71   : > { %v2052_v26 = vpop.f32.mrf.mxu0 }
 0xb72   : > { %v3323_v26 = vld [vmem:[%s4267_s12 + $0x48] sm:$0xff] }
 0xb73   : > { %2470 = vmatpush.bf16.msrb.mxu1 %v3323_v26 }
 0xbd0   : > { %v2190_v28 = vpop.f32.mrf.mxu1 }
 0xbd8   : > { %v2192_v29 = vpop.f32.mrf.mxu1 }
 0xbd9   : > { %v3393_v29 = vld [vmem:[%s4266_s11 + $0x1] ss:$0 sm:$0xff] }
 0xbdd   : > { %v2218_v32 = vpop.f32.mrf.mxu2 }
 0xbe5   : > { %v2220_v55 = vpop.f32.mrf.mxu2 }
 0xbe9   : > { %v2246_v33 = vpop.f32.mrf.mxu3  ;;  %v2162_v27 = vpop.f32.mrf.mxu0 }
 0xbea   : > { %v2250_v0 = vadd.f32 %v2190_v28, %v2162_v27  ;;  %v3322_v28 = vld [vmem:[%s4267_s12 + $0x40] sm:$0xff] }
 0xbeb   : > { %2471 = vmatpush.bf16.msrb.mxu1 %v3322_v28 }
 0xbec   : > { %v2251_v35 = vadd.f32 %v2250_v0, %v2218_v32 }
 0xbee   : > { %v2252_v30 = vadd.f32 %v2251_v35, %v2246_v33  ;;  %v3394_v35 = vld [vmem:[%s4268_s13 + $0x1] ss:$0 sm:$0xff] }
 0xbf0   : > { %v2253_v37 = vadd.f32 %v2252_v30, %v3947_v25  ;;  %v3320_v25 = vld [vmem:[%s4265_s10 + $0x70] sm:$0xff] }
 0xbf1   : > { %v2248_v38 = vpop.f32.mrf.mxu3  ;;  %v2164_v39 = vpop.f32.mrf.mxu0  ;;  %2380 = vmatpush.bf16.msrb.mxu0 %v3320_v25 }
 0xbf2   : > { %v4148_v40 = vadd.f32 %v3390_v36, %v2253_v37 }
 0xbf4   : > { %2264 = vadd.xlane.f32.xlu0 %v4148_v40 }
 0xbf5   : > { %2381 = vmatpush.bf16.msrb.mxu0 %v3319_v45 }
 0xbf9   : > { %2382 = vmatpush.bf16.msrb.mxu0 %v3318_v46 }
 0xbfd   : > { %2383 = vmatpush.bf16.msrb.mxu0 %v3317_v47 }
 0xc01   : > { %2384 = vmatpush.bf16.msrb.mxu0 %v3316_v50 }
 0xc05   : > { %2385 = vmatpush.bf16.msrb.mxu0 %v3315_v51 }
 0xc09   : > { %2386 = vmatpush.bf16.msrb.mxu0 %v3314_v56 }
 0xc67   : > { %v2265_v41 = vpop.xlane.xlu0 %2264 }
 0xc68   : > { %v2266_v42 = vmul.f32 %v2265_v41, %v3667_v7 }
 0xc6a   : > { %v2267_v31 = vsub.f32 %v4148_v40, %v2266_v42 }
 0xc6c   : > { %v2268_v43 = vmul.f32 %v2267_v31, %v2267_v31  ;;  %v2275_v19 = vmul.f32 %v3391_v14, %v2267_v31 }
 0xc6e   : > { %2269 = vadd.xlane.f32.xlu2 %v2268_v43 }
 0xce1   : > { %v2270_v48 = vpop.xlane.xlu2 %2269 }
 0xce2   : > { %v2271_v49 = vmul.f32 %v2270_v48, %v3723_v34 }
 0xce4   : > { %3445 = vrsqrt.f32 %v2271_v49  ;;  %vm2283_vm7 = vcmp.eq.f32.partialorder %v2271_v49, inf  ;;  %v2286_v63 = vand.u32 2147483648, %v2271_v49  ;;  %vm2285_vm8 = vcmp.eq.f32.partialorder %v2271_v49, 0.0 }
 0xcea   : > { %v3446_v52 = vpop.eup %3445 }
 0xceb   : > { %v2277_v53 = vmul.f32 %v3446_v52, %v2271_v49 }
 0xced   : > { %v2278_v57 = vmul.f32 %v3446_v52, %v2277_v53 }
 0xcef   : > { %v2279_v58 = vmul.f32 0.5, %v2278_v57 }
 0xcf1   : > { %v2280_v59 = vsub.f32 1.5, %v2279_v58  ;;  %v3395_v58 = vld [vmem:[%s4269_s14] ss:$0 sm:$0xff] }
 0xcf3   : > { %v2281_v60 = vmul.f32 %v3446_v52, %v2280_v59 }
 0xcf5   : > { %v2282_v62 = vmul.f32 %v2281_v60, %v2271_v49 }
 0xcf7   : > { %v2284_v1 = vsel %vm2283_vm7, %v2271_v49, %v2282_v62 }
 0xcf8   : > { %v2287_v2 = vsel %vm2285_vm8, %v2286_v63, %v2284_v1  ;;  %v3396_v1 = vld [vmem:[%s4270_s15] ss:$0 sm:$0xff] }
 0xcf9   : > { %v2288_v4 = vadd.f32 1e-06, %v2287_v2 }
 0xcfb   : > { %3447 = vrcp.f32 %v2288_v4  ;;  %v2300_v13 = vand.u32 2147483648, %v2288_v4  ;;  %v2298_v16 = vand.u32 2147483647, %v2288_v4  ;;  %vm2294_vm10 = vweird.f32 %v2288_v4 }
 0xcfd   : > { %v2301_v18 = vor.u32 1.1754944e-38, %v2300_v13  ;;  %vm2299_vm12 = vcmp.eq.f32.partialorder %v2298_v16, 8.507059e+37 }
 0xd01   : > { %v3448_v8 = vpop.eup %3447 }
 0xd02   : > { %v2290_v9 = vmul.f32 %v3448_v8, %v2288_v4  ;;  %vm2295_vm9 = vweird.f32 %v3448_v8 }
 0xd03   : > { %vm2296_vm11 = vmor %vm2294_vm10, %vm2295_vm9 }
 0xd04   : > { %v2291_v11 = vsub.f32 1.0, %v2290_v9 }
 0xd06   : > { %v2292_v15 = vmul.f32 %v3448_v8, %v2291_v11 }
 0xd08   : > { %v2293_v17 = vadd.f32 %v3448_v8, %v2292_v15 }
 0xd0a   : > { %v2297_v10 = vsel %vm2296_vm11, %v3448_v8, %v2293_v17 }
 0xd0b   : > { %v2302_v21 = vsel %vm2299_vm12, %v2301_v18, %v2297_v10 }
 0xd0c   : > { %v2303_v22 = vmul.f32 %v2302_v21, %v2275_v19 }
 0xd0e   : > { %v2307_v23 = vadd.f32 %v3392_v20, %v2303_v22 }
 0xd10   : > { %v2308_v24 = vpack.c.bf16 %v2307_v23, %v2307_v23 }
 0xd12   : > { %2387 = vmatmul.bf16.vlgmr.msrb.gmra.mxu0 %v2308_v24 }
 0xd8f   : > { %v2388_v32 = vpop.f32.mrf.mxu0 }
 0xd90   : > { %v2389_v55 = vadd.f32 %v3393_v29, %v2388_v32 }
 0xd92   : > { %v2392_v33 = vmax.f32 %v2389_v55, 0.0 }
 0xd94   : > { %v2393_v27 = vpack.c.bf16 %v2392_v33, %v2392_v33 }
 0xd96   : > { %2472 = vmatmul.bf16.vlgmr.msrb.gmra.mxu1 %v2393_v27 }
 0xd97   : > { %v2390_v0 = vpop.f32.mrf.mxu0 }
 0xe13   : > { %v2473_v30 = vpop.f32.mrf.mxu1 }
 0xe14   : > { %v2474_v36 = vadd.f32 %v3394_v35, %v2473_v30 }
 0xe16   : > { %v2477_v37 = vadd.f32 %v2474_v36, %v4148_v40 }
 0xe18   : > { %2480 = vadd.xlane.f32.xlu1 %v2477_v37 }
 0xe1b   : > { %v2475_v38 = vpop.f32.mrf.mxu1 }
 0xe8b   : > { %v2481_v39 = vpop.xlane.xlu1 %2480 }
 0xe8c   : > { %v2482_v41 = vmul.f32 %v2481_v39, %v3667_v7 }
 0xe8e   : > { %v2483_v42 = vsub.f32 %v2477_v37, %v2482_v41 }
 0xe90   : > { %v2484_v31 = vmul.f32 %v2483_v42, %v2483_v42  ;;  %v2491_v62 = vmul.f32 %v3395_v58, %v2483_v42 }
 0xe92   : > { %2485 = vadd.xlane.f32.xlu0 %v2484_v31 }
 0xf05   : > { %v2486_v43 = vpop.xlane.xlu0 %2485 }
 0xf06   : > { %v2487_v44 = vmul.f32 %v2486_v43, %v3723_v34 }
 0xf08   : > { %3449 = vrsqrt.f32 %v2487_v44  ;;  %vm2499_vm13 = vcmp.eq.f32.partialorder %v2487_v44, inf  ;;  %v2502_v50 = vand.u32 2147483648, %v2487_v44  ;;  %vm2501_vm14 = vcmp.eq.f32.partialorder %v2487_v44, 0.0 }
 0xf0e   : > { %v3450_v25 = vpop.eup %3449 }
 0xf0f   : > { %v2493_v45 = vmul.f32 %v3450_v25, %v2487_v44 }
 0xf11   : > { %v2494_v46 = vmul.f32 %v3450_v25, %v2493_v45 }
 0xf13   : > { %v2495_v47 = vmul.f32 0.5, %v2494_v46 }
 0xf15   : > { %v2496_v48 = vsub.f32 1.5, %v2495_v47 }
 0xf17   : > { %v2497_v40 = vmul.f32 %v3450_v25, %v2496_v48 }
 0xf19   : > { %v2498_v49 = vmul.f32 %v2497_v40, %v2487_v44 }
 0xf1b   : > { %v2500_v51 = vsel %vm2499_vm13, %v2487_v44, %v2498_v49 }
 0xf1c   : > { %v2503_v7 = vsel %vm2501_vm14, %v2502_v50, %v2500_v51 }
 0xf1d   : > { %v2504_v52 = vadd.f32 1e-06, %v2503_v7 }
 0xf1f   : > { %3451 = vrcp.f32 %v2504_v52  ;;  %v2516_v57 = vand.u32 2147483648, %v2504_v52  ;;  %v2514_v54 = vand.u32 2147483647, %v2504_v52  ;;  %vm2510_vm0 = vweird.f32 %v2504_v52 }
 0xf21   : > { %v2517_v61 = vor.u32 1.1754944e-38, %v2516_v57  ;;  %vm2515_vm2 = vcmp.eq.f32.partialorder %v2514_v54, 8.507059e+37 }
 0xf25   : > { %v3452_v53 = vpop.eup %3451 }
 0xf26   : > { %v2506_v34 = vmul.f32 %v3452_v53, %v2504_v52  ;;  %vm2511_vm15 = vweird.f32 %v3452_v53 }
 0xf27   : > { %vm2512_vm1 = vmor %vm2510_vm0, %vm2511_vm15 }
 0xf28   : > { %v2507_v56 = vsub.f32 1.0, %v2506_v34 }
 0xf2a   : > { %v2508_v59 = vmul.f32 %v3452_v53, %v2507_v56 }
 0xf2c   : > { %v2509_v60 = vadd.f32 %v3452_v53, %v2508_v59 }
 0xf2e   : > { %v2513_v63 = vsel %vm2512_vm1, %v3452_v53, %v2509_v60 }
 0xf2f   : > { %v2518_v2 = vsel %vm2515_vm2, %v2517_v61, %v2513_v63 }
 0xf30   : > { %v2519_v3 = vmul.f32 %v2518_v2, %v2491_v62 }
 0xf32   : > { %v2523_v4 = vadd.f32 %v3396_v1, %v2519_v3 }
 0xf34   : > { %2524 = vst [vmem:[%s525_s27] sm:$0xff] %v2523_v4 }
 0xf35   : > { %3480 = shalt.err (!%p3477_p3)
}
 0xf36   : > { %3330 = dma.vmem_to_hbm [thread:$0]  (%p3644_p5), %s2539_s18, 128, %s2541_s28, %s2526_s26  }
 0xf37 PF: > { %s4293_s17 = sld [smem:[#allocation5_spill]]  ;;  %p3336_p4 = scmp.ge.s32.totalorder %s3515_s24, 2 }
 0xf39   : > { %p3333_p7 = pnand %p3336_p4, %p3648_p6 }
 0xf3b   : > { %p3334_p8 = pneg %p3333_p7 }
 0xf3d   : > { %s2552_s27 = sand.u32 1, %s4293_s17  }
 0xf3e   : > { %s2553_s19 = scalar_lea.sflag [#allocation3], %s2552_s27 }
 0xf3f   : > { %3498 = dma.done.wait (%p3334_p8), %s2553_s19, 128  }
 0xf40   : > { %3500 = vsyncadd (%p3334_p8), %s2553_s19, 4294967168  ;;  %s4295_s24 = sld [smem:[#allocation7_spill]]  ;;  %s4298_s21 = smov %s3507_s22 }
 0xf41   : > { %s4296_s1 = sld [smem:[#allocation6_spill]] }
 0xf42   : > { %s4297_s23 = sld [smem:[#allocation8_spill]] }
 0xf46   : > { %p26_p9 = scmp.ge.s32.totalorder %s4295_s24, 4  }
 0xf47   : > { %s4299_s22 = smov %s4296_s1 }
 0xf48   :  { %28 = sbr.rel (!%p26_p9) target bundleno = 6 (0x6), region = 134 }
 0xf4d   :  { %2559 = vsyncpa [#allocation3], 1 }
 0xf4e   :  { %2561 = vsyncpa [#allocation3 + $0x1], 1 }

</bundles_post_ra>
